<compile_context>
chip_gen: v5e
topology: v5e:2x2
jax: 0.10.0
libtpu: 0.0.40
codegen_flags: <defaults>
</compile_context>

<pallas_src>
import functools
import math

import jax
import jax.numpy as jnp
from jax.experimental import pallas as pl
from jax.experimental.pallas import tpu as pltpu

_MIB = 1024 * 1024


# ---------------------------------------------------------------------------
# small host-side helpers
# ---------------------------------------------------------------------------
def _round_up(x, m):
    return (x + m - 1) // m * m


def _vmem_capacity_bytes():
    try:
        info = pltpu.get_tpu_info()
        cap = getattr(info, "vmem_capacity_bytes", None)
        if cap:
            return int(cap)
    except Exception:
        pass
    return 128 * _MIB


def _vmem_budget():
    # leave headroom for compiler scratch / spills: ~75% of physical VMEM
    return int(0.75 * _vmem_capacity_bytes())


def _single_buffer_mode():
    # pl.Buffered(1): do not double-buffer operands whose index_map is constant.
    for ctor in (lambda: pl.Buffered(1), lambda: pl.Buffered(buffer_count=1)):
        try:
            return ctor()
        except Exception:
            continue
    return None


_SINGLE_BUF = _single_buffer_mode()


def _const_spec(arr):
    """BlockSpec for a grid-invariant (resident) operand: full block, single buffer."""
    rank = arr.ndim
    idx = lambda i, _r=rank: (0,) * _r
    if _SINGLE_BUF is not None:
        try:
            return pl.BlockSpec(arr.shape, idx, pipeline_mode=_SINGLE_BUF)
        except TypeError:
            pass
    return pl.BlockSpec(arr.shape, idx)


def _divisors_desc(n, cap=None):
    ds = [d for d in range(1, n + 1) if n % d == 0]
    if cap is not None:
        ds = [d for d in ds if d <= cap]
    return sorted(ds, reverse=True)


def _dff_tile_candidates(dff):
    cands = []
    for k in (1, 2, 4, 8, 16):
        if dff % k == 0:
            t = dff // k
            if (t == dff or t % 128 == 0) and t not in cands:
                cands.append(t)
    return cands or [dff]


def _resblock_vmem_est(nb, lp, d, h, dff_tile, w_bytes):
    rows = nb * lp
    io = 2 * 2 * rows * d * 2                      # in+out blocks, double-buffered bf16
    inter = rows * (8 * d + dff_tile) * 4          # f32 temps (x, qkv, attn, h2, h1 chunk)
    inter += rows * (4 * d + dff_tile) * 2         # bf16 temps (xn, q/k/v, xn2, h1 cast)
    inter += nb * h * lp * lp * 6                  # scores f32 + probs bf16
    return io + w_bytes + int(1.25 * inter)


def _choose_resblock_tiling(n, lp, d, h, dff, w_bytes, budget):
    """nb (sequences / grid step) and the Dff tile, sized against device VMEM."""
    for nb in _divisors_desc(n, cap=16):
        if n // nb < 2 and n > 1:       # keep >=2 grid steps (v7x megacore sharding)
            continue
        for t in _dff_tile_candidates(dff):
            if _resblock_vmem_est(nb, lp, d, h, t, w_bytes) <= int(0.85 * budget):
                return nb, t
    return 1, _dff_tile_candidates(dff)[-1]


def _pick_embed_nb(n, hw, k, d, lp, budget):
    for nbe in _divisors_desc(n, cap=32):
        if n // nbe < 2 and n > 1:
            continue
        est = (4 * nbe * hw * k * 2 + k * d * 2 + 4 * nbe * lp * d * 2
               + int(1.25 * nbe * hw * d * 4 * 3))
        if est <= int(0.5 * budget):
            return nbe
    return 1


# ---------------------------------------------------------------------------
# in-kernel helper
# ---------------------------------------------------------------------------
def _ln(x, g, b, eps=1e-5):
    m = jnp.mean(x, axis=-1, keepdims=True)
    v = jnp.mean(jnp.square(x - m), axis=-1, keepdims=True)
    return (x - m) * jax.lax.rsqrt(v + eps) * g + b


# ---------------------------------------------------------------------------
# Pallas kernels
# ---------------------------------------------------------------------------
def _embed_lnpre_kernel(p_ref, w_ref, cls_ref, pos_ref, g_ref, b_ref, o_ref):
    # Fused conv1-as-matmul + [cls] + pos-embed + ln_pre for nbe sequences.
    # p_ref: (nbe, hw, K) bf16   w_ref: (K, D) bf16   cls: (1, D)   pos: (L, D)
    # o_ref: (nbe, Lp, D) bf16 with Lp = round_up(hw+1, 8); padded rows zeroed.
    nbe, hw, K = p_ref.shape
    D = w_ref.shape[1]
    Lp = o_ref.shape[1]
    L = hw + 1
    g = g_ref[...]
    b = b_ref[...]

    tok = jnp.dot(p_ref[...].reshape(nbe * hw, K), w_ref[...],
                  preferred_element_type=jnp.float32).reshape(nbe, hw, D)
    tok = tok + pos_ref[1:, :].astype(jnp.float32)[None]
    patch_rows = _ln(tok, g, b)                                        # (nbe, hw, D)

    cls_row = _ln(cls_ref[...].astype(jnp.float32)
                  + pos_ref[0:1, :].astype(jnp.float32), g, b)         # (1, D)

    o_ref[:, 0:1, :] = jnp.broadcast_to(cls_row[None, :, :], (nbe, 1, D)).astype(o_ref.dtype)
    o_ref[:, 1:L, :] = patch_rows.astype(o_ref.dtype)
    if Lp > L:
        o_ref[:, L:, :] = jnp.zeros((nbe, Lp - L, D), o_ref.dtype)


def _resblock_kernel(x_ref, ln1g, ln1b, wqkv, bqkv, wo, bo,
                     ln2g, ln2b, wfc, bfc, wpj, bpj, o_ref, *,
                     num_heads, seq_len, dff_tile):
    # CLIP ResidualAttentionBlock on a (NB, Lp, D) bf16 tile:
    #   x = x + MHA(ln_1(x));  x = x + MLP(ln_2(x))   (QuickGELU in the MLP)
    NB, Lp, D = x_ref.shape
    H = num_heads
    dh = D // H
    rows = NB * Lp

    x = x_ref[...].astype(jnp.float32).reshape(rows, D)

    # --- multi-head self-attention (1/sqrt(dh) pre-folded into w_qkv / b_qkv) ---
    xn = _ln(x, ln1g[...], ln1b[...])
    qkv = jnp.dot(xn.astype(jnp.bfloat16), wqkv[...],
                  preferred_element_type=jnp.float32) + bqkv[...]      # (rows, 3D) f32

    def heads(cols):
        # (rows, D) f32 -> (NB*H, Lp, dh) bf16, head-major batch for one batched einsum
        m4 = cols.reshape(NB, Lp, H, dh)
        return pltpu.einshape("nlhd->nhld", m4).reshape(NB * H, Lp, dh).astype(jnp.bfloat16)

    qh = heads(qkv[:, 0:D])
    kh = heads(qkv[:, D:2 * D])
    vh = heads(qkv[:, 2 * D:3 * D])

    s = jnp.einsum("bqd,bkd->bqk", qh, kh,
                   preferred_element_type=jnp.float32)                 # (NB*H, Lp, Lp)
    if seq_len < Lp:                                                   # mask padded keys
        kidx = jax.lax.broadcasted_iota(jnp.int32, (1, 1, Lp), 2)
        s = jnp.where(kidx < seq_len, s, -1e30)
    s = s - jnp.max(s, axis=-1, keepdims=True)
    p = jnp.exp(s)
    p = p * pl.reciprocal(jnp.sum(p, axis=-1, keepdims=True), approx=True)
    oh = jnp.einsum("bqk,bkd->bqd", p.astype(jnp.bfloat16), vh,
                    preferred_element_type=jnp.float32)                # (NB*H, Lp, dh)

    attn = pltpu.einshape("nhld->nlhd", oh.reshape(NB, H, Lp, dh)).reshape(rows, D)
    attn = jnp.dot(attn.astype(jnp.bfloat16), wo[...],
                   preferred_element_type=jnp.float32) + bo[...]
    x = x + attn

    # --- MLP with QuickGELU, tiled over the Dff axis -----------------------------
    xn2 = _ln(x, ln2g[...], ln2b[...]).astype(jnp.bfloat16)
    Dff = wfc.shape[1]
    n_chunks = Dff // dff_tile

    if n_chunks == 1:
        h1 = jnp.dot(xn2, wfc[...], preferred_element_type=jnp.float32) + bfc[...]
        h1 = h1 * jax.nn.sigmoid(1.702 * h1)                           # QuickGELU (f32)
        h2 = jnp.dot(h1.astype(jnp.bfloat16), wpj[...],
                     preferred_element_type=jnp.float32)
    else:
        def mlp_chunk(c, acc):
            off = pl.multiple_of(c * dff_tile, dff_tile)
            h1 = jnp.dot(xn2, wfc[:, pl.ds(off, dff_tile)],
                         preferred_element_type=jnp.float32) + bfc[:, pl.ds(off, dff_tile)]
            h1 = h1 * jax.nn.sigmoid(1.702 * h1)
            return acc + jnp.dot(h1.astype(jnp.bfloat16), wpj[pl.ds(off, dff_tile), :],
                                 preferred_element_type=jnp.float32)

        h2 = jax.lax.fori_loop(0, n_chunks, mlp_chunk,
                               jnp.zeros((rows, D), jnp.float32))

    o_ref[...] = (x + h2 + bpj[...]).reshape(NB, Lp, D).astype(o_ref.dtype)


def _cls_head_kernel(x_ref, g_ref, b_ref, proj_ref, o_ref):
    # x_ref: (B, T, D) bf16 -> ln_post -> @ proj (lane-padded) -> mean over T -> (B, Dp)
    B, T, D = x_ref.shape
    x = x_ref[...].astype(jnp.float32).reshape(B * T, D)
    xn = _ln(x, g_ref[...], b_ref[...])
    y = jnp.dot(xn.astype(jnp.bfloat16), proj_ref[...],
                preferred_element_type=jnp.float32)                    # (B*T, Dp)
    y = y.reshape(B, T, -1)
    o_ref[...] = jnp.mean(y, axis=1).astype(o_ref.dtype)


# ---------------------------------------------------------------------------
# pallas_call wrappers
# ---------------------------------------------------------------------------
def embed_tokens(patches, wmat, cls_emb, pos_emb, gamma, beta, *, Lp, nbe, vmem_limit):
    N, hw, K = patches.shape
    D = wmat.shape[1]
    return pl.pallas_call(
        _embed_lnpre_kernel,
        out_shape=jax.ShapeDtypeStruct((N, Lp, D), jnp.bfloat16),
        grid=(N // nbe,),
        in_specs=[pl.BlockSpec((nbe, hw, K), lambda i: (i, 0, 0)),
                  _const_spec(wmat), _const_spec(cls_emb), _const_spec(pos_emb),
                  _const_spec(gamma), _const_spec(beta)],
        out_specs=pl.BlockSpec((nbe, Lp, D), lambda i: (i, 0, 0)),
        compiler_params=pltpu.CompilerParams(
            dimension_semantics=("parallel",),
            vmem_limit_bytes=int(vmem_limit)),
    )(patches, wmat, cls_emb, pos_emb, gamma, beta)


def resblock(x, blk, *, num_heads, seq_len, nb, dff_tile, vmem_limit):
    N, Lp, D = x.shape
    assert N % nb == 0
    dff = blk["w_fc"].shape[1]
    assert dff % dff_tile == 0
    scale = 1.0 / math.sqrt(D // num_heads)

    # fold the 1/sqrt(dh) attention scale into the Q columns (host-side, free in-kernel)
    w_qkv = blk["w_qkv"]
    w_qkv = jnp.concatenate([w_qkv[:, :D] * scale, w_qkv[:, D:]], axis=1).astype(jnp.bfloat16)
    b_qkv = blk["b_qkv"]
    b_qkv = jnp.concatenate([b_qkv[:, :D] * scale, b_qkv[:, D:]], axis=1)

    weights = [blk["ln1_g"], blk["ln1_b"], w_qkv, b_qkv,
               blk["w_out"].astype(jnp.bfloat16), blk["b_out"],
               blk["ln2_g"], blk["ln2_b"],
               blk["w_fc"].astype(jnp.bfloat16), blk["b_fc"],
               blk["w_proj"].astype(jnp.bfloat16), blk["b_proj"]]

    kernel = functools.partial(_resblock_kernel, num_heads=num_heads,
                               seq_len=seq_len, dff_tile=dff_tile)
    return pl.pallas_call(
        kernel,
        out_shape=jax.ShapeDtypeStruct((N, Lp, D), jnp.bfloat16),
        grid=(N // nb,),
        in_specs=[pl.BlockSpec((nb, Lp, D), lambda i: (i, 0, 0))]
                 + [_const_spec(w) for w in weights],
        out_specs=pl.BlockSpec((nb, Lp, D), lambda i: (i, 0, 0)),
        input_output_aliases={0: 0},           # in-place residual-stream update
        compiler_params=pltpu.CompilerParams(
            dimension_semantics=("parallel",),
            vmem_limit_bytes=int(vmem_limit)),
    )(x, *weights)


def cls_head(x_cls, gamma, beta, proj_padded, *, vmem_limit):
    B, T, D = x_cls.shape
    Dp = proj_padded.shape[1]
    return pl.pallas_call(
        _cls_head_kernel,
        out_shape=jax.ShapeDtypeStruct((B, Dp), jnp.float32),
        grid=(1,),
        in_specs=[pl.BlockSpec((B, T, D), lambda i: (0, 0, 0)),
                  _const_spec(gamma), _const_spec(beta), _const_spec(proj_padded)],
        out_specs=pl.BlockSpec((B, Dp), lambda i: (0, 0)),
        compiler_params=pltpu.CompilerParams(
            dimension_semantics=("arbitrary",),
            vmem_limit_bytes=int(vmem_limit)),
    )(x_cls, gamma, beta, proj_padded)


# ---------------------------------------------------------------------------
# Full CLIPModel.forward (== CLIPVisualEncoder.forward, use_cls_feat=True)
# ---------------------------------------------------------------------------
@functools.partial(jax.jit, static_argnums=(2, 3))
def _forward(weights, x, patch, num_heads):
    B, C, T, H, W = x.shape
    h, w = H // patch, W // patch
    hw = h * w
    D = weights["conv1_w"].shape[0]
    L = hw + 1
    Lp = _round_up(L, 8)                       # sublane-aligned sequence length
    N = B * T
    budget = _vmem_budget()

    # ---- conv1 as patch extraction (XLA) + fused embed/cls/pos/ln_pre kernel ----
    x2 = jnp.transpose(x, (0, 2, 1, 3, 4)).reshape(N, C, H, W)
    patches = x2.reshape(N, C, h, patch, w, patch)
    patches = jnp.transpose(patches, (0, 2, 4, 1, 3, 5)).reshape(N, hw, C * patch * patch)
    patches = patches.astype(jnp.bfloat16)
    wmat = weights["conv1_w"].reshape(D, C * patch * patch).T.astype(jnp.bfloat16)

    nbe = _pick_embed_nb(N, hw, C * patch * patch, D, Lp, budget)
    xseq = embed_tokens(patches, wmat, weights["class_embedding"],
                        weights["pos_embedding"], weights["ln_pre_g"],
                        weights["ln_pre_b"], Lp=Lp, nbe=nbe,
                        vmem_limit=min(budget, 64 * _MIB))             # (N, Lp, D) bf16

    # ---- transformer resblocks (bf16 residual stream, in-place per layer) ----
    blk0 = weights["blocks"][0]
    Dff = blk0["w_fc"].shape[1]
    w_bytes = 2 * (D * 3 * D + D * D + 2 * D * Dff) + 4 * (3 * D + D + Dff + D + 4 * D)
    nb, dff_tile = _choose_resblock_tiling(N, Lp, D, num_heads, Dff, w_bytes, budget)
    for blk in weights["blocks"]:
        xseq = resblock(xseq, blk, num_heads=num_heads, seq_len=L,
                        nb=nb, dff_tile=dff_tile, vmem_limit=budget)

    # ---- patch-token output: (B, D, T, h, w), cast back to input dtype ----
    x_patch = xseq[:, 1:L, :].astype(x.dtype).reshape(B, T, h, w, D)
    x_patch = jnp.transpose(x_patch, (0, 4, 1, 2, 3))

    # ---- cls-token head (use_cls_feat=True): ln_post -> @ proj -> mean over T ----
    x_cls = xseq[:, 0, :].reshape(B, T, D)
    proj = weights["proj"]
    Dout = proj.shape[1]
    Dp = _round_up(Dout, 128)                   # lane-pad the tiny output dim
    proj_p = proj.astype(jnp.bfloat16)
    if Dp != Dout:
        proj_p = jnp.pad(proj_p, ((0, 0), (0, Dp - Dout)))
    y = cls_head(x_cls, weights["ln_post_g"], weights["ln_post_b"], proj_p,
                 vmem_limit=min(budget, 32 * _MIB))
    y = y[:, :Dout].astype(x.dtype)

    return [x_patch, x_patch, x_patch, x_patch], y


def clip_model_forward(params, x):
    """x: (B, C, T, H, W) float32 (PyTorch conv-input convention)."""
    patch = params["patch_size"]
    num_heads = params["num_heads"]
    weights = {k: v for k, v in params.items() if k not in ("patch_size", "num_heads")}
    return _forward(weights, x, patch, num_heads)


# ---------------------------------------------------------------------------
# deterministic parameter init (shapes follow CLIP's visual tower, small sizes)
# ---------------------------------------------------------------------------
def init_params(key, *, C, patch, D, L, num_heads, layers, Dout):
    keys = iter(jax.random.split(key, 64))
    s = 0.02

    def rnd(shape):
        return (s * jax.random.normal(next(keys), shape)).astype(jnp.float32)

    params = {
        "patch_size": patch,
        "num_heads": num_heads,
        "conv1_w": rnd((D, C, patch, patch)),            # torch: (out, in, k, k)
        "class_embedding": rnd((1, D)),
        "pos_embedding": rnd((L, D)),
        "ln_pre_g": jnp.ones((1, D), jnp.float32),
        "ln_pre_b": jnp.zeros((1, D), jnp.float32),
        "ln_post_g": jnp.ones((1, D), jnp.float32),
        "ln_post_b": jnp.zeros((1, D), jnp.float32),
        "proj": rnd((D, Dout)),
        "blocks": [],
    }
    Dff = 4 * D
    for _ in range(layers):
        # NOTE: all matrices stored in "y = x @ W" convention; when loading real
        # CLIP weights, torch's in_proj_weight / out_proj.weight / c_fc.weight /
        # c_proj.weight must each be transposed.
        blk = {
            "ln1_g": jnp.ones((1, D), jnp.float32),
            "ln1_b": jnp.zeros((1, D), jnp.float32),
            "w_qkv": rnd((D, 3 * D)),
            "b_qkv": jnp.zeros((1, 3 * D), jnp.float32),
            "w_out": rnd((D, D)),
            "b_out": jnp.zeros((1, D), jnp.float32),
            "ln2_g": jnp.ones((1, D), jnp.float32),
            "ln2_b": jnp.zeros((1, D), jnp.float32),
            "w_fc": rnd((D, Dff)),
            "b_fc": jnp.zeros((1, Dff), jnp.float32),
            "w_proj": rnd((Dff, D)),
            "b_proj": jnp.zeros((1, D), jnp.float32),
        }
        params["blocks"].append(blk)
    return params


# ---------------------------------------------------------------------------
if __name__ == "__main__":
    B, C, T, H, W = 2, 3, 2, 16, 16
    patch = 8
    D = 32
    num_heads = 4
    layers = 2
    Dout = 16
    h, w = H // patch, W // patch
    L = h * w + 1

    key = jax.random.PRNGKey(0)
    kx, kp = jax.random.split(key)
    x = jax.random.normal(kx, (B, C, T, H, W), dtype=jnp.float32)
    params = init_params(kp, C=C, patch=patch, D=D, L=L,
                         num_heads=num_heads, layers=layers, Dout=Dout)

    feats, y = clip_model_forward(params, x)
    jax.block_until_ready(feats[0])
    jax.block_until_ready(y)

    assert feats[0].shape == (B, D, T, h, w), feats[0].shape
    assert y.shape == (B, Dout), y.shape
    assert len(feats) == 4
    print("KERNEL_OK")
</pallas_src>

<mosaic_0001>
module attributes {stable_mosaic.version = 11 : i64} {
  func.func @_embed_lnpre_kernel(%arg0: i32, %arg1: memref<2x4x192xbf16, #tpu.memory_space<vmem>>, %arg2: memref<192x32xbf16, #tpu.memory_space<vmem>>, %arg3: memref<1x32xf32, #tpu.memory_space<vmem>>, %arg4: memref<5x32xf32, #tpu.memory_space<vmem>>, %arg5: memref<1x32xf32, #tpu.memory_space<vmem>>, %arg6: memref<1x32xf32, #tpu.memory_space<vmem>>, %arg7: memref<2x8x32xbf16, #tpu.memory_space<vmem>>) attributes {dimension_semantics = [#tpu.dimension_semantics<parallel>], iteration_bounds = array<i64: 2>, scalar_prefetch = 0 : i64, scratch_operands = 0 : i64, tpu.core_type = #tpu.core_type<tc>, window_params = [{transform_indices = @transform_0, window_bounds = array<i64: 2, 4, 192>}, {pipeline_mode = #tpu.pipeline_mode<synchronous>, transform_indices = @transform_1, window_bounds = array<i64: 192, 32>}, {pipeline_mode = #tpu.pipeline_mode<synchronous>, transform_indices = @transform_2, window_bounds = array<i64: 1, 32>}, {pipeline_mode = #tpu.pipeline_mode<synchronous>, transform_indices = @transform_3, window_bounds = array<i64: 5, 32>}, {pipeline_mode = #tpu.pipeline_mode<synchronous>, transform_indices = @transform_4, window_bounds = array<i64: 1, 32>}, {pipeline_mode = #tpu.pipeline_mode<synchronous>, transform_indices = @transform_5, window_bounds = array<i64: 1, 32>}, {transform_indices = @transform_6, window_bounds = array<i64: 2, 8, 32>}]} {
    %c0 = arith.constant 0 : index
    %c0_0 = arith.constant 0 : index
    %0 = vector.load %arg5[%c0, %c0_0] : memref<1x32xf32, #tpu.memory_space<vmem>>, vector<1x32xf32>
    %c0_1 = arith.constant 0 : index
    %c0_2 = arith.constant 0 : index
    %1 = vector.load %arg6[%c0_1, %c0_2] : memref<1x32xf32, #tpu.memory_space<vmem>>, vector<1x32xf32>
    %c0_3 = arith.constant 0 : index
    %c0_4 = arith.constant 0 : index
    %c0_5 = arith.constant 0 : index
    %2 = vector.load %arg1[%c0_3, %c0_4, %c0_5] : memref<2x4x192xbf16, #tpu.memory_space<vmem>>, vector<2x4x192xbf16>
    %3 = vector.shape_cast %2 : vector<2x4x192xbf16> to vector<8x192xbf16>
    %c0_6 = arith.constant 0 : index
    %c0_7 = arith.constant 0 : index
    %4 = vector.load %arg2[%c0_6, %c0_7] : memref<192x32xbf16, #tpu.memory_space<vmem>>, vector<192x32xbf16>
    %cst = arith.constant dense<0.000000e+00> : vector<8x32xf32>
    %5 = tpu.matmul %3, %4, %cst {dimension_numbers = #tpu.dot_dimension_numbers<[1], [0], [0], [1], [0, 0, 1, 1], [], []>} : vector<8x192xbf16>, vector<192x32xbf16>, vector<8x32xf32> -> vector<8x32xf32>
    %6 = vector.shape_cast %5 : vector<8x32xf32> to vector<2x4x32xf32>
    %c1 = arith.constant 1 : index
    %c0_8 = arith.constant 0 : index
    %7 = vector.load %arg4[%c1, %c0_8] : memref<5x32xf32, #tpu.memory_space<vmem>>, vector<4x32xf32>
    %8 = vector.shape_cast %7 : vector<4x32xf32> to vector<1x4x32xf32>
    %9 = vector.broadcast %8 : vector<1x4x32xf32> to vector<2x4x32xf32>
    %10 = arith.addf %6, %9 : vector<2x4x32xf32>
    %cst_9 = arith.constant dense<0.000000e+00> : vector<2x4xf32>
    %11 = vector.multi_reduction <add>, %10, %cst_9 [2] : vector<2x4x32xf32> to vector<2x4xf32>
    %12 = vector.shape_cast %11 : vector<2x4xf32> to vector<2x4x1xf32>
    %cst_10 = arith.constant 3.200000e+01 : f32
    %13 = vector.broadcast %cst_10 : f32 to vector<2x4x1xf32>
    %14 = arith.divf %12, %13 : vector<2x4x1xf32>
    %15 = vector.broadcast %14 : vector<2x4x1xf32> to vector<2x4x32xf32>
    %16 = arith.subf %10, %15 : vector<2x4x32xf32>
    %17 = arith.mulf %16, %16 : vector<2x4x32xf32>
    %cst_11 = arith.constant dense<0.000000e+00> : vector<2x4xf32>
    %18 = vector.multi_reduction <add>, %17, %cst_11 [2] : vector<2x4x32xf32> to vector<2x4xf32>
    %19 = vector.shape_cast %18 : vector<2x4xf32> to vector<2x4x1xf32>
    %cst_12 = arith.constant 3.200000e+01 : f32
    %20 = vector.broadcast %cst_12 : f32 to vector<2x4x1xf32>
    %21 = arith.divf %19, %20 : vector<2x4x1xf32>
    %22 = vector.broadcast %14 : vector<2x4x1xf32> to vector<2x4x32xf32>
    %23 = arith.subf %10, %22 : vector<2x4x32xf32>
    %cst_13 = arith.constant 9.99999974E-6 : f32
    %24 = vector.broadcast %cst_13 : f32 to vector<2x4x1xf32>
    %25 = arith.addf %21, %24 : vector<2x4x1xf32>
    %26 = math.rsqrt %25 : vector<2x4x1xf32>
    %27 = vector.broadcast %26 : vector<2x4x1xf32> to vector<2x4x32xf32>
    %28 = arith.mulf %23, %27 : vector<2x4x32xf32>
    %29 = vector.shape_cast %0 : vector<1x32xf32> to vector<1x1x32xf32>
    %30 = vector.broadcast %29 : vector<1x1x32xf32> to vector<2x4x32xf32>
    %31 = arith.mulf %28, %30 : vector<2x4x32xf32>
    %32 = vector.shape_cast %1 : vector<1x32xf32> to vector<1x1x32xf32>
    %33 = vector.broadcast %32 : vector<1x1x32xf32> to vector<2x4x32xf32>
    %34 = arith.addf %31, %33 : vector<2x4x32xf32>
    %c0_14 = arith.constant 0 : index
    %c0_15 = arith.constant 0 : index
    %35 = vector.load %arg3[%c0_14, %c0_15] : memref<1x32xf32, #tpu.memory_space<vmem>>, vector<1x32xf32>
    %c0_16 = arith.constant 0 : index
    %c0_17 = arith.constant 0 : index
    %36 = vector.load %arg4[%c0_16, %c0_17] : memref<5x32xf32, #tpu.memory_space<vmem>>, vector<1x32xf32>
    %37 = arith.addf %35, %36 : vector<1x32xf32>
    %cst_18 = arith.constant dense<0.000000e+00> : vector<1xf32>
    %38 = vector.multi_reduction <add>, %37, %cst_18 [1] : vector<1x32xf32> to vector<1xf32>
    %39 = vector.shape_cast %38 : vector<1xf32> to vector<1x1xf32>
    %cst_19 = arith.constant 3.200000e+01 : f32
    %40 = vector.broadcast %cst_19 : f32 to vector<1x1xf32>
    %41 = arith.divf %39, %40 : vector<1x1xf32>
    %42 = vector.broadcast %41 : vector<1x1xf32> to vector<1x32xf32>
    %43 = arith.subf %37, %42 : vector<1x32xf32>
    %44 = arith.mulf %43, %43 : vector<1x32xf32>
    %cst_20 = arith.constant dense<0.000000e+00> : vector<1xf32>
    %45 = vector.multi_reduction <add>, %44, %cst_20 [1] : vector<1x32xf32> to vector<1xf32>
    %46 = vector.shape_cast %45 : vector<1xf32> to vector<1x1xf32>
    %cst_21 = arith.constant 3.200000e+01 : f32
    %47 = vector.broadcast %cst_21 : f32 to vector<1x1xf32>
    %48 = arith.divf %46, %47 : vector<1x1xf32>
    %49 = vector.broadcast %41 : vector<1x1xf32> to vector<1x32xf32>
    %50 = arith.subf %37, %49 : vector<1x32xf32>
    %cst_22 = arith.constant 9.99999974E-6 : f32
    %51 = vector.broadcast %cst_22 : f32 to vector<1x1xf32>
    %52 = arith.addf %48, %51 : vector<1x1xf32>
    %53 = math.rsqrt %52 : vector<1x1xf32>
    %54 = vector.broadcast %53 : vector<1x1xf32> to vector<1x32xf32>
    %55 = arith.mulf %50, %54 : vector<1x32xf32>
    %56 = arith.mulf %55, %0 : vector<1x32xf32>
    %57 = arith.addf %56, %1 : vector<1x32xf32>
    %58 = vector.shape_cast %57 : vector<1x32xf32> to vector<1x1x32xf32>
    %59 = vector.shape_cast %58 : vector<1x1x32xf32> to vector<1x1x32xf32>
    %60 = vector.broadcast %59 : vector<1x1x32xf32> to vector<2x1x32xf32>
    %61 = arith.truncf %60 : vector<2x1x32xf32> to vector<2x1x32xbf16>
    %c0_23 = arith.constant 0 : index
    %c0_24 = arith.constant 0 : index
    %c0_25 = arith.constant 0 : index
    %62 = vector.load %arg7[%c0_23, %c0_24, %c0_25] : memref<2x8x32xbf16, #tpu.memory_space<vmem>>, vector<2x1x32xbf16>
    tpu.vector_store %arg7[%c0_23, %c0_24, %c0_25], %61 {strides = array<i32>} : memref<2x8x32xbf16, #tpu.memory_space<vmem>>, vector<2x1x32xbf16>,
    %63 = arith.truncf %34 : vector<2x4x32xf32> to vector<2x4x32xbf16>
    %c0_26 = arith.constant 0 : index
    %c1_27 = arith.constant 1 : index
    %c0_28 = arith.constant 0 : index
    %64 = vector.load %arg7[%c0_26, %c1_27, %c0_28] : memref<2x8x32xbf16, #tpu.memory_space<vmem>>, vector<2x4x32xbf16>
    tpu.vector_store %arg7[%c0_26, %c1_27, %c0_28], %63 {strides = array<i32>} : memref<2x8x32xbf16, #tpu.memory_space<vmem>>, vector<2x4x32xbf16>,
    %cst_29 = arith.constant 0.000000e+00 : bf16
    %65 = vector.broadcast %cst_29 : bf16 to vector<2x3x32xbf16>
    %c0_30 = arith.constant 0 : index
    %c5 = arith.constant 5 : index
    %c0_31 = arith.constant 0 : index
    %66 = vector.load %arg7[%c0_30, %c5, %c0_31] : memref<2x8x32xbf16, #tpu.memory_space<vmem>>, vector<2x3x32xbf16>
    tpu.vector_store %arg7[%c0_30, %c5, %c0_31], %65 {strides = array<i32>} : memref<2x8x32xbf16, #tpu.memory_space<vmem>>, vector<2x3x32xbf16>,
    return
  }
  func.func @transform_0(%arg0: i32) -> (i32, i32, i32) {
    %c0_i32 = arith.constant 0 : i32
    %c0_i32_0 = arith.constant 0 : i32
    %c0_i32_1 = arith.constant 0 : i32
    return %arg0, %c0_i32, %c0_i32_0 : i32, i32, i32
  }
  func.func @transform_1(%arg0: i32) -> (i32, i32) {
    %c0_i32 = arith.constant 0 : i32
    %c0_i32_0 = arith.constant 0 : i32
    %c0_i32_1 = arith.constant 0 : i32
    return %c0_i32, %c0_i32_0 : i32, i32
  }
  func.func @transform_2(%arg0: i32) -> (i32, i32) {
    %c0_i32 = arith.constant 0 : i32
    %c0_i32_0 = arith.constant 0 : i32
    %c0_i32_1 = arith.constant 0 : i32
    return %c0_i32, %c0_i32_0 : i32, i32
  }
  func.func @transform_3(%arg0: i32) -> (i32, i32) {
    %c0_i32 = arith.constant 0 : i32
    %c0_i32_0 = arith.constant 0 : i32
    %c0_i32_1 = arith.constant 0 : i32
    return %c0_i32, %c0_i32_0 : i32, i32
  }
  func.func @transform_4(%arg0: i32) -> (i32, i32) {
    %c0_i32 = arith.constant 0 : i32
    %c0_i32_0 = arith.constant 0 : i32
    %c0_i32_1 = arith.constant 0 : i32
    return %c0_i32, %c0_i32_0 : i32, i32
  }
  func.func @transform_5(%arg0: i32) -> (i32, i32) {
    %c0_i32 = arith.constant 0 : i32
    %c0_i32_0 = arith.constant 0 : i32
    %c0_i32_1 = arith.constant 0 : i32
    return %c0_i32, %c0_i32_0 : i32, i32
  }
  func.func @transform_6(%arg0: i32) -> (i32, i32, i32) {
    %c0_i32 = arith.constant 0 : i32
    %c0_i32_0 = arith.constant 0 : i32
    %c0_i32_1 = arith.constant 0 : i32
    return %arg0, %c0_i32, %c0_i32_0 : i32, i32, i32
  }
}

module attributes {stable_mosaic.version = 11 : i64} {
  func.func @_resblock_kernel(%arg0: i32, %arg1: memref<2x8x32xbf16, #tpu.memory_space<vmem>>, %arg2: memref<1x32xf32, #tpu.memory_space<vmem>>, %arg3: memref<1x32xf32, #tpu.memory_space<vmem>>, %arg4: memref<32x96xbf16, #tpu.memory_space<vmem>>, %arg5: memref<1x96xf32, #tpu.memory_space<vmem>>, %arg6: memref<32x32xbf16, #tpu.memory_space<vmem>>, %arg7: memref<1x32xf32, #tpu.memory_space<vmem>>, %arg8: memref<1x32xf32, #tpu.memory_space<vmem>>, %arg9: memref<1x32xf32, #tpu.memory_space<vmem>>, %arg10: memref<32x128xbf16, #tpu.memory_space<vmem>>, %arg11: memref<1x128xf32, #tpu.memory_space<vmem>>, %arg12: memref<128x32xbf16, #tpu.memory_space<vmem>>, %arg13: memref<1x32xf32, #tpu.memory_space<vmem>>, %arg14: memref<2x8x32xbf16, #tpu.memory_space<vmem>>) attributes {dimension_semantics = [#tpu.dimension_semantics<parallel>], iteration_bounds = array<i64: 2>, scalar_prefetch = 0 : i64, scratch_operands = 0 : i64, tpu.core_type = #tpu.core_type<tc>, window_params = [{transform_indices = @transform_0, window_bounds = array<i64: 2, 8, 32>}, {pipeline_mode = #tpu.pipeline_mode<synchronous>, transform_indices = @transform_1, window_bounds = array<i64: 1, 32>}, {pipeline_mode = #tpu.pipeline_mode<synchronous>, transform_indices = @transform_2, window_bounds = array<i64: 1, 32>}, {pipeline_mode = #tpu.pipeline_mode<synchronous>, transform_indices = @transform_3, window_bounds = array<i64: 32, 96>}, {pipeline_mode = #tpu.pipeline_mode<synchronous>, transform_indices = @transform_4, window_bounds = array<i64: 1, 96>}, {pipeline_mode = #tpu.pipeline_mode<synchronous>, transform_indices = @transform_5, window_bounds = array<i64: 32, 32>}, {pipeline_mode = #tpu.pipeline_mode<synchronous>, transform_indices = @transform_6, window_bounds = array<i64: 1, 32>}, {pipeline_mode = #tpu.pipeline_mode<synchronous>, transform_indices = @transform_7, window_bounds = array<i64: 1, 32>}, {pipeline_mode = #tpu.pipeline_mode<synchronous>, transform_indices = @transform_8, window_bounds = array<i64: 1, 32>}, {pipeline_mode = #tpu.pipeline_mode<synchronous>, transform_indices = @transform_9, window_bounds = array<i64: 32, 128>}, {pipeline_mode = #tpu.pipeline_mode<synchronous>, transform_indices = @transform_10, window_bounds = array<i64: 1, 128>}, {pipeline_mode = #tpu.pipeline_mode<synchronous>, transform_indices = @transform_11, window_bounds = array<i64: 128, 32>}, {pipeline_mode = #tpu.pipeline_mode<synchronous>, transform_indices = @transform_12, window_bounds = array<i64: 1, 32>}, {transform_indices = @transform_13, window_bounds = array<i64: 2, 8, 32>}]} {
    %c0 = arith.constant 0 : index
    %c0_0 = arith.constant 0 : index
    %c0_1 = arith.constant 0 : index
    %0 = vector.load %arg1[%c0, %c0_0, %c0_1] : memref<2x8x32xbf16, #tpu.memory_space<vmem>>, vector<2x8x32xbf16>
    %1 = arith.extf %0 : vector<2x8x32xbf16> to vector<2x8x32xf32>
    %2 = vector.shape_cast %1 : vector<2x8x32xf32> to vector<16x32xf32>
    %c0_2 = arith.constant 0 : index
    %c0_3 = arith.constant 0 : index
    %3 = vector.load %arg2[%c0_2, %c0_3] : memref<1x32xf32, #tpu.memory_space<vmem>>, vector<1x32xf32>
    %c0_4 = arith.constant 0 : index
    %c0_5 = arith.constant 0 : index
    %4 = vector.load %arg3[%c0_4, %c0_5] : memref<1x32xf32, #tpu.memory_space<vmem>>, vector<1x32xf32>
    %cst = arith.constant dense<0.000000e+00> : vector<16xf32>
    %5 = vector.multi_reduction <add>, %2, %cst [1] : vector<16x32xf32> to vector<16xf32>
    %6 = vector.shape_cast %5 : vector<16xf32> to vector<16x1xf32>
    %cst_6 = arith.constant 3.200000e+01 : f32
    %7 = vector.broadcast %cst_6 : f32 to vector<16x1xf32>
    %8 = arith.divf %6, %7 : vector<16x1xf32>
    %9 = vector.broadcast %8 : vector<16x1xf32> to vector<16x32xf32>
    %10 = arith.subf %2, %9 : vector<16x32xf32>
    %11 = arith.mulf %10, %10 : vector<16x32xf32>
    %cst_7 = arith.constant dense<0.000000e+00> : vector<16xf32>
    %12 = vector.multi_reduction <add>, %11, %cst_7 [1] : vector<16x32xf32> to vector<16xf32>
    %13 = vector.shape_cast %12 : vector<16xf32> to vector<16x1xf32>
    %cst_8 = arith.constant 3.200000e+01 : f32
    %14 = vector.broadcast %cst_8 : f32 to vector<16x1xf32>
    %15 = arith.divf %13, %14 : vector<16x1xf32>
    %16 = vector.broadcast %8 : vector<16x1xf32> to vector<16x32xf32>
    %17 = arith.subf %2, %16 : vector<16x32xf32>
    %cst_9 = arith.constant 9.99999974E-6 : f32
    %18 = vector.broadcast %cst_9 : f32 to vector<16x1xf32>
    %19 = arith.addf %15, %18 : vector<16x1xf32>
    %20 = math.rsqrt %19 : vector<16x1xf32>
    %21 = vector.broadcast %20 : vector<16x1xf32> to vector<16x32xf32>
    %22 = arith.mulf %17, %21 : vector<16x32xf32>
    %23 = vector.broadcast %3 : vector<1x32xf32> to vector<16x32xf32>
    %24 = arith.mulf %22, %23 : vector<16x32xf32>
    %25 = vector.broadcast %4 : vector<1x32xf32> to vector<16x32xf32>
    %26 = arith.addf %24, %25 : vector<16x32xf32>
    %27 = arith.truncf %26 : vector<16x32xf32> to vector<16x32xbf16>
    %c0_10 = arith.constant 0 : index
    %c0_11 = arith.constant 0 : index
    %28 = vector.load %arg4[%c0_10, %c0_11] : memref<32x96xbf16, #tpu.memory_space<vmem>>, vector<32x96xbf16>
    %cst_12 = arith.constant dense<0.000000e+00> : vector<16x96xf32>
    %29 = tpu.matmul %27, %28, %cst_12 {dimension_numbers = #tpu.dot_dimension_numbers<[1], [0], [0], [1], [0, 0, 1, 1], [], []>} : vector<16x32xbf16>, vector<32x96xbf16>, vector<16x96xf32> -> vector<16x96xf32>
    %c0_13 = arith.constant 0 : index
    %c0_14 = arith.constant 0 : index
    %30 = vector.load %arg5[%c0_13, %c0_14] : memref<1x96xf32, #tpu.memory_space<vmem>>, vector<1x96xf32>
    %31 = vector.broadcast %30 : vector<1x96xf32> to vector<16x96xf32>
    %32 = arith.addf %29, %31 : vector<16x96xf32>
    %33 = vector.extract_strided_slice %32 {offsets = [0, 0], sizes = [16, 32], strides = [1, 1]} : vector<16x96xf32> to vector<16x32xf32>
    %34 = vector.shape_cast %33 : vector<16x32xf32> to vector<2x8x4x8xf32>
    %35 = tpu.transpose %34, [0, 2, 1, 3] : vector<2x8x4x8xf32> -> vector<2x4x8x8xf32>
    %36 = vector.shape_cast %35 : vector<2x4x8x8xf32> to vector<8x8x8xf32>
    %37 = arith.truncf %36 : vector<8x8x8xf32> to vector<8x8x8xbf16>
    %38 = vector.extract_strided_slice %32 {offsets = [0, 32], sizes = [16, 32], strides = [1, 1]} : vector<16x96xf32> to vector<16x32xf32>
    %39 = vector.shape_cast %38 : vector<16x32xf32> to vector<2x8x4x8xf32>
    %40 = tpu.transpose %39, [0, 2, 1, 3] : vector<2x8x4x8xf32> -> vector<2x4x8x8xf32>
    %41 = vector.shape_cast %40 : vector<2x4x8x8xf32> to vector<8x8x8xf32>
    %42 = arith.truncf %41 : vector<8x8x8xf32> to vector<8x8x8xbf16>
    %43 = vector.extract_strided_slice %32 {offsets = [0, 64], sizes = [16, 32], strides = [1, 1]} : vector<16x96xf32> to vector<16x32xf32>
    %44 = vector.shape_cast %43 : vector<16x32xf32> to vector<2x8x4x8xf32>
    %45 = tpu.transpose %44, [0, 2, 1, 3] : vector<2x8x4x8xf32> -> vector<2x4x8x8xf32>
    %46 = vector.shape_cast %45 : vector<2x4x8x8xf32> to vector<8x8x8xf32>
    %47 = arith.truncf %46 : vector<8x8x8xf32> to vector<8x8x8xbf16>
    "tpu.trace_start"() <{level = 10 : i32, message = "bqd,bkd->bqk"}> : () -> ()
    %cst_15 = arith.constant dense<0.000000e+00> : vector<8x8x8xf32>
    %48 = tpu.matmul %37, %42, %cst_15 {dimension_numbers = #tpu.dot_dimension_numbers<[2], [2], [1], [1], [0, 0, 0, 1, 1, 1], [0], [0]>} : vector<8x8x8xbf16>, vector<8x8x8xbf16>, vector<8x8x8xf32> -> vector<8x8x8xf32>
    "tpu.trace_stop"() : () -> ()
    %49 = tpu.iota {dimensions = array<i32: 2>} : vector<1x1x8xi32>
    %c5_i32 = arith.constant 5 : i32
    %50 = vector.broadcast %c5_i32 : i32 to vector<1x1x8xi32>
    %51 = arith.cmpi slt, %49, %50 : vector<1x1x8xi32>
    %cst_16 = arith.constant -1.000000e+30 : f32
    %52 = vector.shape_cast %51 : vector<1x1x8xi1> to vector<1x1x8xi1>
    %53 = vector.broadcast %52 : vector<1x1x8xi1> to vector<8x8x8xi1>
    %54 = vector.broadcast %cst_16 : f32 to vector<8x8x8xf32>
    %55 = arith.select %53, %48, %54 : vector<8x8x8xi1>, vector<8x8x8xf32>
    %cst_17 = arith.constant dense<0xFF800000> : vector<8x8xf32>
    %56 = vector.multi_reduction <maximumf>, %55, %cst_17 [2] : vector<8x8x8xf32> to vector<8x8xf32>
    %57 = vector.shape_cast %56 : vector<8x8xf32> to vector<8x8x1xf32>
    %58 = vector.broadcast %57 : vector<8x8x1xf32> to vector<8x8x8xf32>
    %59 = arith.subf %55, %58 : vector<8x8x8xf32>
    %60 = math.exp %59 : vector<8x8x8xf32>
    %cst_18 = arith.constant dense<0.000000e+00> : vector<8x8xf32>
    %61 = vector.multi_reduction <add>, %60, %cst_18 [2] : vector<8x8x8xf32> to vector<8x8xf32>
    %62 = vector.shape_cast %61 : vector<8x8xf32> to vector<8x8x1xf32>
    %63 = tpu.reciprocal %62 {approx = true} : vector<8x8x1xf32> -> vector<8x8x1xf32>
    %64 = vector.broadcast %63 : vector<8x8x1xf32> to vector<8x8x8xf32>
    %65 = arith.mulf %60, %64 : vector<8x8x8xf32>
    %66 = arith.truncf %65 : vector<8x8x8xf32> to vector<8x8x8xbf16>
    "tpu.trace_start"() <{level = 10 : i32, message = "bqk,bkd->bqd"}> : () -> ()
    %cst_19 = arith.constant dense<0.000000e+00> : vector<8x8x8xf32>
    %67 = tpu.matmul %66, %47, %cst_19 {dimension_numbers = #tpu.dot_dimension_numbers<[2], [1], [1], [2], [0, 0, 0, 1, 1, 2], [0], [0]>} : vector<8x8x8xbf16>, vector<8x8x8xbf16>, vector<8x8x8xf32> -> vector<8x8x8xf32>
    "tpu.trace_stop"() : () -> ()
    %68 = vector.shape_cast %67 : vector<8x8x8xf32> to vector<2x4x8x8xf32>
    %69 = tpu.transpose %68, [0, 2, 1, 3] : vector<2x4x8x8xf32> -> vector<2x8x4x8xf32>
    %70 = vector.shape_cast %69 : vector<2x8x4x8xf32> to vector<16x32xf32>
    %71 = arith.truncf %70 : vector<16x32xf32> to vector<16x32xbf16>
    %c0_20 = arith.constant 0 : index
    %c0_21 = arith.constant 0 : index
    %72 = vector.load %arg6[%c0_20, %c0_21] : memref<32x32xbf16, #tpu.memory_space<vmem>>, vector<32x32xbf16>
    %cst_22 = arith.constant dense<0.000000e+00> : vector<16x32xf32>
    %73 = tpu.matmul %71, %72, %cst_22 {dimension_numbers = #tpu.dot_dimension_numbers<[1], [0], [0], [1], [0, 0, 1, 1], [], []>} : vector<16x32xbf16>, vector<32x32xbf16>, vector<16x32xf32> -> vector<16x32xf32>
    %c0_23 = arith.constant 0 : index
    %c0_24 = arith.constant 0 : index
    %74 = vector.load %arg7[%c0_23, %c0_24] : memref<1x32xf32, #tpu.memory_space<vmem>>, vector<1x32xf32>
    %75 = vector.broadcast %74 : vector<1x32xf32> to vector<16x32xf32>
    %76 = arith.addf %73, %75 : vector<16x32xf32>
    %77 = arith.addf %2, %76 : vector<16x32xf32>
    %c0_25 = arith.constant 0 : index
    %c0_26 = arith.constant 0 : index
    %78 = vector.load %arg8[%c0_25, %c0_26] : memref<1x32xf32, #tpu.memory_space<vmem>>, vector<1x32xf32>
    %c0_27 = arith.constant 0 : index
    %c0_28 = arith.constant 0 : index
    %79 = vector.load %arg9[%c0_27, %c0_28] : memref<1x32xf32, #tpu.memory_space<vmem>>, vector<1x32xf32>
    %cst_29 = arith.constant dense<0.000000e+00> : vector<16xf32>
    %80 = vector.multi_reduction <add>, %77, %cst_29 [1] : vector<16x32xf32> to vector<16xf32>
    %81 = vector.shape_cast %80 : vector<16xf32> to vector<16x1xf32>
    %cst_30 = arith.constant 3.200000e+01 : f32
    %82 = vector.broadcast %cst_30 : f32 to vector<16x1xf32>
    %83 = arith.divf %81, %82 : vector<16x1xf32>
    %84 = vector.broadcast %83 : vector<16x1xf32> to vector<16x32xf32>
    %85 = arith.subf %77, %84 : vector<16x32xf32>
    %86 = arith.mulf %85, %85 : vector<16x32xf32>
    %cst_31 = arith.constant dense<0.000000e+00> : vector<16xf32>
    %87 = vector.multi_reduction <add>, %86, %cst_31 [1] : vector<16x32xf32> to vector<16xf32>
    %88 = vector.shape_cast %87 : vector<16xf32> to vector<16x1xf32>
    %cst_32 = arith.constant 3.200000e+01 : f32
    %89 = vector.broadcast %cst_32 : f32 to vector<16x1xf32>
    %90 = arith.divf %88, %89 : vector<16x1xf32>
    %91 = vector.broadcast %83 : vector<16x1xf32> to vector<16x32xf32>
    %92 = arith.subf %77, %91 : vector<16x32xf32>
    %cst_33 = arith.constant 9.99999974E-6 : f32
    %93 = vector.broadcast %cst_33 : f32 to vector<16x1xf32>
    %94 = arith.addf %90, %93 : vector<16x1xf32>
    %95 = math.rsqrt %94 : vector<16x1xf32>
    %96 = vector.broadcast %95 : vector<16x1xf32> to vector<16x32xf32>
    %97 = arith.mulf %92, %96 : vector<16x32xf32>
    %98 = vector.broadcast %78 : vector<1x32xf32> to vector<16x32xf32>
    %99 = arith.mulf %97, %98 : vector<16x32xf32>
    %100 = vector.broadcast %79 : vector<1x32xf32> to vector<16x32xf32>
    %101 = arith.addf %99, %100 : vector<16x32xf32>
    %102 = arith.truncf %101 : vector<16x32xf32> to vector<16x32xbf16>
    %c0_34 = arith.constant 0 : index
    %c0_35 = arith.constant 0 : index
    %103 = vector.load %arg10[%c0_34, %c0_35] : memref<32x128xbf16, #tpu.memory_space<vmem>>, vector<32x128xbf16>
    %cst_36 = arith.constant dense<0.000000e+00> : vector<16x128xf32>
    %104 = tpu.matmul %102, %103, %cst_36 {dimension_numbers = #tpu.dot_dimension_numbers<[1], [0], [0], [1], [0, 0, 1, 1], [], []>} : vector<16x32xbf16>, vector<32x128xbf16>, vector<16x128xf32> -> vector<16x128xf32>
    %c0_37 = arith.constant 0 : index
    %c0_38 = arith.constant 0 : index
    %105 = vector.load %arg11[%c0_37, %c0_38] : memref<1x128xf32, #tpu.memory_space<vmem>>, vector<1x128xf32>
    %106 = vector.broadcast %105 : vector<1x128xf32> to vector<16x128xf32>
    %107 = arith.addf %104, %106 : vector<16x128xf32>
    %cst_39 = arith.constant 1.702000e+00 : f32
    %108 = vector.broadcast %cst_39 : f32 to vector<16x128xf32>
    %109 = arith.mulf %108, %107 : vector<16x128xf32>
    %110 = arith.negf %109 : vector<16x128xf32>
    %111 = math.exp %110 : vector<16x128xf32>
    %cst_40 = arith.constant 1.000000e+00 : f32
    %112 = vector.broadcast %cst_40 : f32 to vector<16x128xf32>
    %113 = arith.addf %112, %111 : vector<16x128xf32>
    %114 = arith.divf %112, %113 : vector<16x128xf32>
    %115 = arith.mulf %107, %114 : vector<16x128xf32>
    %116 = arith.truncf %115 : vector<16x128xf32> to vector<16x128xbf16>
    %c0_41 = arith.constant 0 : index
    %c0_42 = arith.constant 0 : index
    %117 = vector.load %arg12[%c0_41, %c0_42] : memref<128x32xbf16, #tpu.memory_space<vmem>>, vector<128x32xbf16>
    %cst_43 = arith.constant dense<0.000000e+00> : vector<16x32xf32>
    %118 = tpu.matmul %116, %117, %cst_43 {dimension_numbers = #tpu.dot_dimension_numbers<[1], [0], [0], [1], [0, 0, 1, 1], [], []>} : vector<16x128xbf16>, vector<128x32xbf16>, vector<16x32xf32> -> vector<16x32xf32>
    %119 = arith.addf %77, %118 : vector<16x32xf32>
    %c0_44 = arith.constant 0 : index
    %c0_45 = arith.constant 0 : index
    %120 = vector.load %arg13[%c0_44, %c0_45] : memref<1x32xf32, #tpu.memory_space<vmem>>, vector<1x32xf32>
    %121 = vector.broadcast %120 : vector<1x32xf32> to vector<16x32xf32>
    %122 = arith.addf %119, %121 : vector<16x32xf32>
    %123 = vector.shape_cast %122 : vector<16x32xf32> to vector<2x8x32xf32>
    %124 = arith.truncf %123 : vector<2x8x32xf32> to vector<2x8x32xbf16>
    %c0_46 = arith.constant 0 : index
    %c0_47 = arith.constant 0 : index
    %c0_48 = arith.constant 0 : index
    %125 = vector.load %arg14[%c0_46, %c0_47, %c0_48] : memref<2x8x32xbf16, #tpu.memory_space<vmem>>, vector<2x8x32xbf16>
    tpu.vector_store %arg14[%c0_46, %c0_47, %c0_48], %124 {strides = array<i32>} : memref<2x8x32xbf16, #tpu.memory_space<vmem>>, vector<2x8x32xbf16>,
    return
  }
  func.func @transform_0(%arg0: i32) -> (i32, i32, i32) {
    %c0_i32 = arith.constant 0 : i32
    %c0_i32_0 = arith.constant 0 : i32
    %c0_i32_1 = arith.constant 0 : i32
    return %arg0, %c0_i32, %c0_i32_0 : i32, i32, i32
  }
  func.func @transform_1(%arg0: i32) -> (i32, i32) {
    %c0_i32 = arith.constant 0 : i32
    %c0_i32_0 = arith.constant 0 : i32
    %c0_i32_1 = arith.constant 0 : i32
    return %c0_i32, %c0_i32_0 : i32, i32
  }
  func.func @transform_2(%arg0: i32) -> (i32, i32) {
    %c0_i32 = arith.constant 0 : i32
    %c0_i32_0 = arith.constant 0 : i32
    %c0_i32_1 = arith.constant 0 : i32
    return %c0_i32, %c0_i32_0 : i32, i32
  }
  func.func @transform_3(%arg0: i32) -> (i32, i32) {
    %c0_i32 = arith.constant 0 : i32
    %c0_i32_0 = arith.constant 0 : i32
    %c0_i32_1 = arith.constant 0 : i32
    return %c0_i32, %c0_i32_0 : i32, i32
  }
  func.func @transform_4(%arg0: i32) -> (i32, i32) {
    %c0_i32 = arith.constant 0 : i32
    %c0_i32_0 = arith.constant 0 : i32
    %c0_i32_1 = arith.constant 0 : i32
    return %c0_i32, %c0_i32_0 : i32, i32
  }
  func.func @transform_5(%arg0: i32) -> (i32, i32) {
    %c0_i32 = arith.constant 0 : i32
    %c0_i32_0 = arith.constant 0 : i32
    %c0_i32_1 = arith.constant 0 : i32
    return %c0_i32, %c0_i32_0 : i32, i32
  }
  func.func @transform_6(%arg0: i32) -> (i32, i32) {
    %c0_i32 = arith.constant 0 : i32
    %c0_i32_0 = arith.constant 0 : i32
    %c0_i32_1 = arith.constant 0 : i32
    return %c0_i32, %c0_i32_0 : i32, i32
  }
  func.func @transform_7(%arg0: i32) -> (i32, i32) {
    %c0_i32 = arith.constant 0 : i32
    %c0_i32_0 = arith.constant 0 : i32
    %c0_i32_1 = arith.constant 0 : i32
    return %c0_i32, %c0_i32_0 : i32, i32
  }
  func.func @transform_8(%arg0: i32) -> (i32, i32) {
    %c0_i32 = arith.constant 0 : i32
    %c0_i32_0 = arith.constant 0 : i32
    %c0_i32_1 = arith.constant 0 : i32
    return %c0_i32, %c0_i32_0 : i32, i32
  }
  func.func @transform_9(%arg0: i32) -> (i32, i32) {
    %c0_i32 = arith.constant 0 : i32
    %c0_i32_0 = arith.constant 0 : i32
    %c0_i32_1 = arith.constant 0 : i32
    return %c0_i32, %c0_i32_0 : i32, i32
  }
  func.func @transform_10(%arg0: i32) -> (i32, i32) {
    %c0_i32 = arith.constant 0 : i32
    %c0_i32_0 = arith.constant 0 : i32
    %c0_i32_1 = arith.constant 0 : i32
    return %c0_i32, %c0_i32_0 : i32, i32
  }
  func.func @transform_11(%arg0: i32) -> (i32, i32) {
    %c0_i32 = arith.constant 0 : i32
    %c0_i32_0 = arith.constant 0 : i32
    %c0_i32_1 = arith.constant 0 : i32
    return %c0_i32, %c0_i32_0 : i32, i32
  }
  func.func @transform_12(%arg0: i32) -> (i32, i32) {
    %c0_i32 = arith.constant 0 : i32
    %c0_i32_0 = arith.constant 0 : i32
    %c0_i32_1 = arith.constant 0 : i32
    return %c0_i32, %c0_i32_0 : i32, i32
  }
  func.func @transform_13(%arg0: i32) -> (i32, i32, i32) {
    %c0_i32 = arith.constant 0 : i32
    %c0_i32_0 = arith.constant 0 : i32
    %c0_i32_1 = arith.constant 0 : i32
    return %arg0, %c0_i32, %c0_i32_0 : i32, i32, i32
  }
}

module attributes {stable_mosaic.version = 11 : i64} {
  func.func @_cls_head_kernel(%arg0: i32, %arg1: memref<2x2x32xbf16, #tpu.memory_space<vmem>>, %arg2: memref<1x32xf32, #tpu.memory_space<vmem>>, %arg3: memref<1x32xf32, #tpu.memory_space<vmem>>, %arg4: memref<32x128xbf16, #tpu.memory_space<vmem>>, %arg5: memref<2x128xf32, #tpu.memory_space<vmem>>) attributes {dimension_semantics = [#tpu.dimension_semantics<arbitrary>], iteration_bounds = array<i64: 1>, scalar_prefetch = 0 : i64, scratch_operands = 0 : i64, tpu.core_type = #tpu.core_type<tc>, window_params = [{pipeline_mode = #tpu.pipeline_mode<synchronous>, transform_indices = @transform_0, window_bounds = array<i64: 2, 2, 32>}, {pipeline_mode = #tpu.pipeline_mode<synchronous>, transform_indices = @transform_1, window_bounds = array<i64: 1, 32>}, {pipeline_mode = #tpu.pipeline_mode<synchronous>, transform_indices = @transform_2, window_bounds = array<i64: 1, 32>}, {pipeline_mode = #tpu.pipeline_mode<synchronous>, transform_indices = @transform_3, window_bounds = array<i64: 32, 128>}, {pipeline_mode = #tpu.pipeline_mode<synchronous>, transform_indices = @transform_4, window_bounds = array<i64: 2, 128>}]} {
    %c0 = arith.constant 0 : index
    %c0_0 = arith.constant 0 : index
    %c0_1 = arith.constant 0 : index
    %0 = vector.load %arg1[%c0, %c0_0, %c0_1] : memref<2x2x32xbf16, #tpu.memory_space<vmem>>, vector<2x2x32xbf16>
    %1 = arith.extf %0 : vector<2x2x32xbf16> to vector<2x2x32xf32>
    %2 = vector.shape_cast %1 : vector<2x2x32xf32> to vector<4x32xf32>
    %c0_2 = arith.constant 0 : index
    %c0_3 = arith.constant 0 : index
    %3 = vector.load %arg2[%c0_2, %c0_3] : memref<1x32xf32, #tpu.memory_space<vmem>>, vector<1x32xf32>
    %c0_4 = arith.constant 0 : index
    %c0_5 = arith.constant 0 : index
    %4 = vector.load %arg3[%c0_4, %c0_5] : memref<1x32xf32, #tpu.memory_space<vmem>>, vector<1x32xf32>
    %cst = arith.constant dense<0.000000e+00> : vector<4xf32>
    %5 = vector.multi_reduction <add>, %2, %cst [1] : vector<4x32xf32> to vector<4xf32>
    %6 = vector.shape_cast %5 : vector<4xf32> to vector<4x1xf32>
    %cst_6 = arith.constant 3.200000e+01 : f32
    %7 = vector.broadcast %cst_6 : f32 to vector<4x1xf32>
    %8 = arith.divf %6, %7 : vector<4x1xf32>
    %9 = vector.broadcast %8 : vector<4x1xf32> to vector<4x32xf32>
    %10 = arith.subf %2, %9 : vector<4x32xf32>
    %11 = arith.mulf %10, %10 : vector<4x32xf32>
    %cst_7 = arith.constant dense<0.000000e+00> : vector<4xf32>
    %12 = vector.multi_reduction <add>, %11, %cst_7 [1] : vector<4x32xf32> to vector<4xf32>
    %13 = vector.shape_cast %12 : vector<4xf32> to vector<4x1xf32>
    %cst_8 = arith.constant 3.200000e+01 : f32
    %14 = vector.broadcast %cst_8 : f32 to vector<4x1xf32>
    %15 = arith.divf %13, %14 : vector<4x1xf32>
    %16 = vector.broadcast %8 : vector<4x1xf32> to vector<4x32xf32>
    %17 = arith.subf %2, %16 : vector<4x32xf32>
    %cst_9 = arith.constant 9.99999974E-6 : f32
    %18 = vector.broadcast %cst_9 : f32 to vector<4x1xf32>
    %19 = arith.addf %15, %18 : vector<4x1xf32>
    %20 = math.rsqrt %19 : vector<4x1xf32>
    %21 = vector.broadcast %20 : vector<4x1xf32> to vector<4x32xf32>
    %22 = arith.mulf %17, %21 : vector<4x32xf32>
    %23 = vector.broadcast %3 : vector<1x32xf32> to vector<4x32xf32>
    %24 = arith.mulf %22, %23 : vector<4x32xf32>
    %25 = vector.broadcast %4 : vector<1x32xf32> to vector<4x32xf32>
    %26 = arith.addf %24, %25 : vector<4x32xf32>
    %27 = arith.truncf %26 : vector<4x32xf32> to vector<4x32xbf16>
    %c0_10 = arith.constant 0 : index
    %c0_11 = arith.constant 0 : index
    %28 = vector.load %arg4[%c0_10, %c0_11] : memref<32x128xbf16, #tpu.memory_space<vmem>>, vector<32x128xbf16>
    %cst_12 = arith.constant dense<0.000000e+00> : vector<4x128xf32>
    %29 = tpu.matmul %27, %28, %cst_12 {dimension_numbers = #tpu.dot_dimension_numbers<[1], [0], [0], [1], [0, 0, 1, 1], [], []>} : vector<4x32xbf16>, vector<32x128xbf16>, vector<4x128xf32> -> vector<4x128xf32>
    %30 = vector.shape_cast %29 : vector<4x128xf32> to vector<2x2x128xf32>
    %cst_13 = arith.constant dense<0.000000e+00> : vector<2x128xf32>
    %31 = vector.multi_reduction <add>, %30, %cst_13 [1] : vector<2x2x128xf32> to vector<2x128xf32>
    %cst_14 = arith.constant 2.000000e+00 : f32
    %32 = vector.broadcast %cst_14 : f32 to vector<2x128xf32>
    %33 = arith.divf %31, %32 : vector<2x128xf32>
    %c0_15 = arith.constant 0 : index
    %c0_16 = arith.constant 0 : index
    %34 = vector.load %arg5[%c0_15, %c0_16] : memref<2x128xf32, #tpu.memory_space<vmem>>, vector<2x128xf32>
    tpu.vector_store %arg5[%c0_15, %c0_16], %33 {strides = array<i32>} : memref<2x128xf32, #tpu.memory_space<vmem>>, vector<2x128xf32>,
    return
  }
  func.func @transform_0(%arg0: i32) -> (i32, i32, i32) {
    %c0_i32 = arith.constant 0 : i32
    %c0_i32_0 = arith.constant 0 : i32
    %c0_i32_1 = arith.constant 0 : i32
    %c0_i32_2 = arith.constant 0 : i32
    return %c0_i32, %c0_i32_0, %c0_i32_1 : i32, i32, i32
  }
  func.func @transform_1(%arg0: i32) -> (i32, i32) {
    %c0_i32 = arith.constant 0 : i32
    %c0_i32_0 = arith.constant 0 : i32
    %c0_i32_1 = arith.constant 0 : i32
    return %c0_i32, %c0_i32_0 : i32, i32
  }
  func.func @transform_2(%arg0: i32) -> (i32, i32) {
    %c0_i32 = arith.constant 0 : i32
    %c0_i32_0 = arith.constant 0 : i32
    %c0_i32_1 = arith.constant 0 : i32
    return %c0_i32, %c0_i32_0 : i32, i32
  }
  func.func @transform_3(%arg0: i32) -> (i32, i32) {
    %c0_i32 = arith.constant 0 : i32
    %c0_i32_0 = arith.constant 0 : i32
    %c0_i32_1 = arith.constant 0 : i32
    return %c0_i32, %c0_i32_0 : i32, i32
  }
  func.func @transform_4(%arg0: i32) -> (i32, i32) {
    %c0_i32 = arith.constant 0 : i32
    %c0_i32_0 = arith.constant 0 : i32
    %c0_i32_1 = arith.constant 0 : i32
    return %c0_i32, %c0_i32_0 : i32, i32
  }
}

</mosaic_0001>

<bundles_post_ra>
// kernel: _forward.4
= control target key start
LH: loop header
LB: loop body
LE: loop exit
PB: predicated region body
PF: predicated region fallthrough
CT: control target
= control target key end

     0   :  { %s731_s21 = smov 0   ;;  %s846_s0 = inlined_call_operand.vmem [shape: bf16[4,4,192], index: 0, kind: input, shape index: {}]   ;;  %s847_s1 = inlined_call_operand.vmem [shape: bf16[192,32], index: 1, kind: input, shape index: {}]   ;;  %s848_s2 = inlined_call_operand.vmem [shape: f32[1,32], index: 2, kind: input, shape index: {}]   ;;  %s849_s3 = inlined_call_operand.vmem [shape: f32[5,32], index: 3, kind: input, shape index: {}]   ;;  %s850_s4 = inlined_call_operand.vmem [shape: f32[1,32], index: 4, kind: input, shape index: {}]   ;;  %s851_s5 = inlined_call_operand.vmem [shape: f32[1,32], index: 5, kind: input, shape index: {}]   ;;  %s852_s6 = inlined_call_operand.vmem [shape: bf16[4,8,32], index: 6, kind: output, shape index: {}]  }
   0x1 LB: > { %s594_s22 = sadd.s32 4294967295, %s693_s21   ;;  %p598_p0 = scmp.ge.s32.totalorder %s693_s21, 1  ;;  %s693_s21 = sphi %s731_s21, %s16_s21  }
   0x2   : > { %p214_p1 = scmp.lt.s32.totalorder %s693_s21, 3 }
   0x4   : > { %p215_p2 = pnand %p598_p0, %p214_p1 }
   0x5   : > { %s599_s25 = sshll.u32 (!%p215_p2), %s594_s22, 1 }
   0x6   : > { %218 = sbr.rel (%p215_p2) target bundleno = 468 (0x1d4), region = 44  ;;  %p246_p3 = scmp.lt.s32.totalorder (!%p215_p2), %s599_s25, 3 }
   0xb   : > { %v663_v0 = vld [vmem:[%s847_s1 + $0x38] sm:$0xff]  ;;  %v662_v2 = vld [vmem:[%s847_s1 + $0x30] sm:$0xff]  ;;  %s854_s25 = smov (!%p246_p3, %s599_s25), 3  ;;  %v464_v4 = vld [vmem:[%s848_s2] sm:$0x1]  ;;  %vm467_vm0 = vcmask 253952  }
   0xc   : > { %v667_v1 = vld [vmem:[%s847_s1 + $0x58] sm:$0xff]  ;;  %370 = vmatpush.bf16.msra.mxu0 %v663_v0  ;;  %v666_v3 = vld [vmem:[%s847_s1 + $0x50] sm:$0xff]  ;;  %v465_v5 = vld [vmem:[%s849_s3] sm:$0x1]  ;;  %s655_s12 = sshll.u32 %s854_s25, 2  ;;  %vm367_vm1 = vcmask 523264  }
   0xd   : > { %387 = vmatpush.bf16.msra.mxu1 %v667_v1  ;;  %v466_v6 = vadd.f32 %v465_v5, %v464_v4  ;;  %v661_v7 = vld [vmem:[%s847_s1 + $0x28] sm:$0xff]  ;;  %s250_s17 = scalar_lea.vmem %s846_s0, %s655_s12  ;;  %v660_v12 = vld [vmem:[%s847_s1 + $0x20] sm:$0xff]  ;;  %v659_v14 = vld [vmem:[%s847_s1 + $0x18] sm:$0xff]  ;;  %v695_v20 = vmov 32.0   ;;  %vm402_vm3 = vcmask 257024   ;;  %s819_s19 = scalar_lea.vmem %s852_s6, %s655_s12  ;;  %vm520_vm15 = vcmask 256000  }
   0xe   : > { %v665_v8 = vld [vmem:[%s847_s1 + $0x48] sm:$0xff]  ;;  %v261_v9 = vld [vmem:[%s250_s17] sm:$0xf]  ;;  %v262_v10 = vld [vmem:[%s250_s17 + $0x4] sm:$0xf]  ;;  %679 = vrcp.f32 %v695_v20 }
   0xf   : > { %v468_v11 = vsel %vm467_vm0, %v466_v6, 0.0  ;;  %288 = vst [vmem:[#allocation1] ss:$4 sm:$0xff] %v261_v9  ;;  %v664_v13 = vld [vmem:[%s847_s1 + $0x40] sm:$0xff]  ;;  %v658_v16 = vld [vmem:[%s847_s1 + $0x10] sm:$0xff]  ;;  %v657_v17 = vld [vmem:[%s847_s1 + $0x8] sm:$0xff] }
  0x10   : > { %371 = vmatpush.bf16.msra.mxu0 %v662_v2  ;;  %469 = vadd.xlane.f32.xlu0 %v468_v11  ;;  %291 = vst [vmem:[#allocation1 + $0x1] ss:$4 sm:$0xff] %v262_v10  ;;  %v656_v18 = vld [vmem:[%s847_s1] sm:$0xff]  ;;  %vm494_vm7 = vsmask.f32 256 }
  0x11   : > { %388 = vmatpush.bf16.msra.mxu1 %v666_v3  ;;  %v399_v31 = vld [vmem:[%s849_s3 + $0x1] sm:$0xf]  ;;  %v259_v62 = vld [vmem:[%s850_s4] sm:$0x1]  ;;  %vm495_vm8 = vmand %vm467_vm0, %vm494_vm7 }
  0x12   : > { %v260_v1 = vld [vmem:[%s851_s5] sm:$0x1] }
  0x13   : > { %v496_v4 = vld [vmem:[%s819_s19] sm:$0x1] }
  0x14   : > { %372 = vmatpush.bf16.msra.mxu0 %v661_v7  ;;  %v680_v21 = vpop.eup %679  ;;  %v499_v7 = vld [vmem:[%s819_s19 + $0x4] sm:$0x1] }
  0x15   : > { %389 = vmatpush.bf16.msra.mxu1 %v665_v8  ;;  %v410_v22 = vmul.f32 32.0, %v680_v21  ;;  %vm414_vm2 = vweird.f32 %v680_v21 }
  0x17   : > { %v293_v15 = vld.sshfl [vmem:[#allocation1 + $0x8] sm:$0xff pattern:$0x73625140]  ;;  %v292_v19 = vld.sshfl [vmem:[#allocation1] sm:$0xff pattern:$0x73625140] }
  0x18   : > { %373 = vmatpush.bf16.msra.mxu0 %v660_v12  ;;  %v411_v24 = vsub.f32 1.0, %v410_v22 }
  0x19   : > { %390 = vmatpush.bf16.msra.mxu1 %v664_v13 }
  0x1a   : > { %v412_v25 = vmul.f32 %v680_v21, %v411_v24 }
  0x1c   : > { %374 = vmatpush.bf16.msra.mxu0 %v659_v14  ;;  %652 = vmatmul.msk.bf16.vlgmr.msra.gmra.mxu1 %vm367_vm1, %v293_v15  ;;  %v413_v27 = vadd.f32 %v680_v21, %v412_v25 }
  0x1e   : > { %v790_v29 = vsel %vm414_vm2, %v680_v21, %v413_v27  ;;  %vm529_vm2 = vcmask 257026  }
  0x20   : > { %375 = vmatpush.bf16.msra.mxu0 %v658_v16 }
  0x24   : > { %376 = vmatpush.bf16.msra.mxu0 %v657_v17 }
  0x28   : > { %377 = vmatpush.bf16.msra.mxu0 %v656_v18 }
  0x2b   : > { %378 = vmatmul.bf16.vlgmr.msra.gmra.mxu0 %v292_v19 }
  0x83   : > { %v470_v28 = vpop.xlane.xlu0 %469 }
  0x84   : > { %v471_v33 = vmul.f32 %v470_v28, %v790_v29 }
  0x86   : > { %v472_v37 = vsub.f32 %v466_v6, %v471_v33 }
  0x88   : > { %v473_v41 = vmul.f32 %v472_v37, %v472_v37 }
  0x8a   : > { %v474_v42 = vsel %vm467_vm0, %v473_v41, 0.0  ;;  %vm521_vm0 = vsmask.f32 2306 }
  0x8b   : > { %vm522_vm1 = vmand %vm520_vm15, %vm521_vm0 }
  0x99   : > { %v392_v23 = vpop.f32.mrf.mxu1 }
  0xa1   : > { %v394_v26 = vpop.f32.mrf.mxu1 }
  0xa2   : > { %v678_v26 = vld [vmem:[%s851_s5] ss:$0 sm:$0xff] }
  0xa8   : > { %v379_v30 = vpop.f32.mrf.mxu0 }
  0xa9   : > { %v393_v32 = vadd.f32 %v392_v23, %v379_v30  ;;  %v677_v23 = vld [vmem:[%s850_s4] ss:$0 sm:$0xff] }
  0xab   : > { %v397_v34 = vrot.slane %v393_v32, 4  ;;  %v400_v35 = vadd.f32 %v399_v31, %v393_v32 }
  0xad   : > { %v403_v36 = vsel %vm402_vm3, %v400_v35, 0.0  ;;  %v401_v38 = vadd.f32 %v399_v31, %v397_v34 }
  0xae   : > { %404 = vadd.xlane.f32.xlu0 %v403_v36 }
  0xaf   : > { %v406_v39 = vsel %vm402_vm3, %v401_v38, 0.0 }
  0xb0   : > { %407 = vadd.xlane.f32.xlu1 %v406_v39  ;;  %v381_v40 = vpop.f32.mrf.mxu0 }
  0xb8   : > { %475 = vadd.xlane.f32.xlu1 %v474_v42 }
 0x121   : > { %v405_v43 = vpop.xlane.xlu0 %404 }
 0x122   : > { %v416_v44 = vmul.f32 %v790_v29, %v405_v43 }
 0x123   : > { %v408_v45 = vpop.xlane.xlu1 %407 }
 0x124   : > { %v418_v46 = vsub.f32 %v400_v35, %v416_v44  ;;  %v417_v47 = vmul.f32 %v790_v29, %v408_v45 }
 0x126   : > { %v420_v48 = vmul.f32 %v418_v46, %v418_v46  ;;  %v801_v49 = vsub.f32 %v401_v38, %v417_v47 }
 0x128   : > { %v422_v50 = vsel %vm402_vm3, %v420_v48, 0.0  ;;  %v421_v53 = vmul.f32 %v801_v49, %v801_v49 }
 0x129   : > { %423 = vadd.xlane.f32.xlu2 %v422_v50 }
 0x12a   : > { %v425_v55 = vsel %vm402_vm3, %v421_v53, 0.0  ;;  %vm530_vm3 = vsmask.f32 7946 }
 0x12b   : > { %v476_v51 = vpop.xlane.xlu1 %475 }
 0x12c   : > { %v477_v52 = vmul.f32 %v476_v51, %v790_v29 }
 0x12e   : > { %v478_v54 = vadd.f32 1e-05, %v477_v52 }
 0x130   : > { %681 = vrsqrt.f32 %v478_v54  ;;  %vm485_vm4 = vweird.f32 %v478_v54 }
 0x131   : > { %426 = vadd.xlane.f32.xlu2 %v425_v55 }
 0x136   : > { %v682_v56 = vpop.eup %681 }
 0x137   : > { %v480_v57 = vmul.f32 %v682_v56, %v478_v54  ;;  %vm486_vm5 = vweird.f32 %v682_v56 }
 0x138   : > { %vm487_vm6 = vmor %vm485_vm4, %vm486_vm5 }
 0x139   : > { %v481_v58 = vmul.f32 %v682_v56, %v480_v57  ;;  %vm531_vm4 = vmand %vm529_vm2, %vm530_vm3 }
 0x13b   : > { %v482_v59 = vmul.f32 0.5, %v481_v58 }
 0x13d   : > { %v483_v60 = vsub.f32 1.5, %v482_v59 }
 0x13f   : > { %v484_v61 = vmul.f32 %v682_v56, %v483_v60 }
 0x141   : > { %v488_v63 = vsel %vm487_vm6, %v682_v56, %v484_v61 }
 0x142   : > { %v489_v0 = vmul.f32 %v488_v63, %v472_v37 }
 0x144   : > { %v490_v2 = vmul.f32 %v489_v0, %v259_v62 }
 0x146   : > { %v491_v3 = vadd.f32 %v490_v2, %v260_v1 }
 0x148   : > { %v492_v5 = vpack.c.bf16 %v491_v3, %v491_v3 }
 0x14a   : > { %v497_v6 = vsel %vm495_vm8, %v492_v5, %v496_v4  ;;  %v500_v8 = vsel %vm495_vm8, %v492_v5, %v499_v7 }
 0x14b   : > { %498 = vst [vmem:[%s819_s19] sm:$0x1] %v497_v6 }
 0x14c   : > { %501 = vst [vmem:[%s819_s19 + $0x4] sm:$0x1] %v500_v8 }
 0x152   : > { %v523_v42 = vld [vmem:[%s819_s19] sm:$0x7] }
 0x19c   : > { %v424_v9 = vpop.xlane.xlu2 %423 }
 0x19d   : > { %v428_v10 = vmul.f32 %v424_v9, %v790_v29 }
 0x19f   : > { %v430_v11 = vadd.f32 1e-05, %v428_v10 }
 0x1a1   : > { %683 = vrsqrt.f32 %v430_v11  ;;  %vm438_vm10 = vweird.f32 %v430_v11 }
 0x1a4   : > { %v427_v12 = vpop.xlane.xlu2 %426 }
 0x1a5   : > { %v429_v13 = vmul.f32 %v427_v12, %v790_v29 }
 0x1a7   : > { %v684_v14 = vpop.eup %683  ;;  %v431_v15 = vadd.f32 1e-05, %v429_v13 }
 0x1a8   : > { %v433_v16 = vmul.f32 %v684_v14, %v430_v11  ;;  %vm439_vm9 = vweird.f32 %v684_v14 }
 0x1a9   : > { %685 = vrsqrt.f32 %v431_v15  ;;  %vm440_vm11 = vmor %vm438_vm10, %vm439_vm9  ;;  %vm448_vm13 = vweird.f32 %v431_v15 }
 0x1aa   : > { %v434_v17 = vmul.f32 %v684_v14, %v433_v16 }
 0x1ac   : > { %v435_v18 = vmul.f32 0.5, %v434_v17 }
 0x1ae   : > { %v436_v19 = vsub.f32 1.5, %v435_v18 }
 0x1af   : > { %v686_v20 = vpop.eup %685 }
 0x1b0   : > { %v437_v21 = vmul.f32 %v684_v14, %v436_v19  ;;  %v443_v22 = vmul.f32 %v686_v20, %v431_v15  ;;  %vm449_vm12 = vweird.f32 %v686_v20 }
 0x1b1   : > { %vm450_vm14 = vmor %vm448_vm13, %vm449_vm12 }
 0x1b2   : > { %v441_v24 = vsel %vm440_vm11, %v684_v14, %v437_v21  ;;  %v444_v25 = vmul.f32 %v686_v20, %v443_v22 }
 0x1b3   : > { %v452_v27 = vmul.f32 %v441_v24, %v418_v46 }
 0x1b4   : > { %v445_v28 = vmul.f32 0.5, %v444_v25 }
 0x1b5   : > { %v457_v29 = vmul.f32 %v677_v23, %v452_v27 }
 0x1b6   : > { %v446_v30 = vsub.f32 1.5, %v445_v28 }
 0x1b7   : > { %v462_v31 = vadd.f32 %v678_v26, %v457_v29 }
 0x1b8   : > { %v447_v32 = vmul.f32 %v686_v20, %v446_v30 }
 0x1b9   : > { %v502_v33 = vpack.c.bf16 %v462_v31, %v462_v31 }
 0x1ba   : > { %v451_v34 = vsel %vm450_vm14, %v686_v20, %v447_v32 }
 0x1bb   : > { %v505_v35 = vshrl.u32 %v502_v33, 16  ;;  %v453_v36 = vmul.f32 %v451_v34, %v801_v49  ;;  %v508_v38 = vshll.u32 %v502_v33, 16  ;;  %v526_v49 = vld [vmem:[%s819_s19 + $0x4] sm:$0x7] }
 0x1bd   : > { %v507_v37 = vrot.slane %v505_v35, 7  ;;  %v458_v39 = vmul.f32 %v677_v23, %v453_v36 }
 0x1bf   : > { %v510_v40 = vor.u32 %v508_v38, %v507_v37  ;;  %v463_v41 = vadd.f32 %v678_v26, %v458_v39 }
 0x1c1   : > { %v524_v43 = vsel %vm522_vm1, %v510_v40, %v523_v42  ;;  %v503_v44 = vpack.c.bf16 %v463_v41, %v463_v41 }
 0x1c2   : > { %525 = vst [vmem:[%s819_s19] sm:$0x7] %v524_v43 }
 0x1c3   : > { %v512_v45 = vshrl.u32 %v503_v44, 16  ;;  %v515_v47 = vshll.u32 %v503_v44, 16 }
 0x1c5   : > { %v514_v46 = vrot.slane %v512_v45, 7 }
 0x1c7   : > { %v517_v48 = vor.u32 %v515_v47, %v514_v46 }
 0x1c9   : > { %v527_v50 = vsel %vm522_vm1, %v517_v48, %v526_v49  ;;  %v532_v51 = vld [vmem:[%s819_s19] sm:$0xc] }
 0x1ca   : > { %528 = vst [vmem:[%s819_s19 + $0x4] sm:$0x7] %v527_v50  ;;  %v533_v52 = vsel %vm531_vm4, 0, %v532_v51 }
 0x1cb   : > { %534 = vst [vmem:[%s819_s19] sm:$0xc] %v533_v52 }
 0x1d1   : > { %v535_v53 = vld [vmem:[%s819_s19 + $0x4] sm:$0xc] }
 0x1d2   : > { %v536_v54 = vsel %vm531_vm4, 0, %v535_v53 }
 0x1d3   : > { %537 = vst [vmem:[%s819_s19 + $0x4] sm:$0xc] %v536_v54 }
 0x1d4 PF: > { %s16_s21 = sadd.s32 1, %s693_s21  }
 0x1d5   : > { %p13_p4 = scmp.ge.s32.totalorder %s16_s21, 4  }
 0x1d7   :  { %15 = sbr.rel (!%p13_p4) target bundleno = 1 (0x1), region = 75 }

// kernel: _forward.7
= control target key start
LH: loop header
LB: loop body
LE: loop exit
PB: predicated region body
PF: predicated region fallthrough
CT: control target
= control target key end

     0   :  { %s301_s0 = inlined_call_operand.vmem [shape: bf16[2,2,32], index: 0, kind: input, shape index: {}]   ;;  %s302_s1 = inlined_call_operand.vmem [shape: f32[1,32], index: 1, kind: input, shape index: {}]   ;;  %s303_s2 = inlined_call_operand.vmem [shape: f32[1,32], index: 2, kind: input, shape index: {}]   ;;  %s304_s3 = inlined_call_operand.vmem [shape: bf16[32,128], index: 3, kind: input, shape index: {}]   ;;  %s305_s4 = inlined_call_operand.hbm [shape: f32[2,128], index: 4, kind: output, shape index: {}]  }
   0x1   :  { %v19_v0 = vld [vmem:[%s301_s0] sm:$0x1]  ;;  %v20_v1 = vld [vmem:[%s301_s0 + $0x1] sm:$0x1] }
   0x2   :  { %v21_v2 = vunpack.c.l.bf16 %v19_v0  ;;  %v22_v3 = vunpack.c.l.bf16 %v20_v1 }
   0x3   :  { %9 = vsyncpa [#allocation3], 0  ;;  %vm32_vm0 = vcmask 257024   ;;  %v248_v6 = vmov 32.0   ;;  %v249_v12 = vmov 269488144  }
   0x4   :  { %27 = vst [vmem:[#allocation1] ss:$4 sm:$0xff] %v21_v2  ;;  %216 = vrcp.f32 %v248_v6  ;;  %v46_v13 = vunpack.c.l.s4 %v249_v12  ;;  %v250_v14 = vmov 842150450   ;;  %v208_v30 = vld [vmem:[%s304_s3 + $0x8] sm:$0xff]  ;;  %v207_v32 = vld [vmem:[%s304_s3] sm:$0xff] }
   0x5   :  { %29 = vst [vmem:[#allocation1 + $0x1] ss:$4 sm:$0xff] %v22_v3  ;;  %v50_v15 = vunpack.c.l.s4 %v250_v14  ;;  %142 = vmatpush.bf16.msra.mxu0 %v208_v30  ;;  %v214_v39 = vld [vmem:[%s302_s1] ss:$0 sm:$0xff]  ;;  %vm132_vm5 = vcmask 261120   ;;  %v251_v55 = vmov 2.0  }
   0x6   :  { %v47_v17 = vunpack.c.0.s8 %v46_v13  ;;  %v215_v41 = vld [vmem:[%s303_s2] ss:$0 sm:$0xff]  ;;  %v97_v43 = vrot.slane %v214_v39, 2  ;;  %vm152_vm6 = vcmask 1041408   ;;  %s252_s1 = smov [#allocation2]   ;;  %s189_s27 = sshll.u32 %s305_s4, 4  ;;  %s190_s27 = int_to_ptr.hbm [resolvable:$true] %s189_s27 }
   0x7   :  { %v51_v18 = vunpack.c.0.s8 %v50_v15  ;;  %v104_v46 = vrot.slane %v215_v41, 2  ;;  %s187_s2 = sshll.u32 %s252_s1, 4  ;;  %vm178_vm8 = vcmask 1041409   ;;  %s188_s2 = int_to_ptr.vmem [resolvable:$true] %s187_s2 }
   0x9   :  { %143 = vmatpush.bf16.msra.mxu0 %v207_v32 }
   0xa   :  { %v217_v7 = vpop.eup %216 }
   0xb   :  { %v37_v8 = vmul.f32 32.0, %v217_v7  ;;  %vm41_vm1 = vweird.f32 %v217_v7 }
   0xc   :  { %v30_v4 = vld.sshfl [vmem:[#allocation1] sm:$0xff pattern:$0x73625140] }
   0xd   :  { %v33_v5 = vsel %vm32_vm0, %v30_v4, 0.0  ;;  %v38_v9 = vsub.f32 1.0, %v37_v8 }
   0xe   :  { %34 = vadd.xlane.f32.xlu0 %v33_v5 }
   0xf   :  { %v39_v10 = vmul.f32 %v217_v7, %v38_v9 }
  0x11   :  { %v40_v11 = vadd.f32 %v217_v7, %v39_v10 }
  0x13   :  { %v42_v16 = vsel %vm41_vm1, %v217_v7, %v40_v11 }
  0x81   :  { %v35_v19 = vpop.xlane.xlu0 %34 }
  0x82   :  { %v43_v20 = vmul.f32 %v42_v16, %v35_v19 }
  0x84   :  { %v48_v21 = vperm.slane %v43_v20, %v47_v17  ;;  %v52_v22 = vperm.slane %v43_v20, %v51_v18 }
  0x86   :  { %v55_v23 = vsub.f32 %v21_v2, %v48_v21  ;;  %v56_v24 = vsub.f32 %v22_v3, %v52_v22 }
  0x88   :  { %v57_v25 = vmul.f32 %v55_v23, %v55_v23  ;;  %v58_v26 = vmul.f32 %v56_v24, %v56_v24 }
  0x8a   :  { %61 = vst [vmem:[#allocation1] ss:$4 sm:$0xff] %v57_v25 }
  0x8b   :  { %63 = vst [vmem:[#allocation1 + $0x1] ss:$4 sm:$0xff] %v58_v26 }
  0x92   :  { %v64_v27 = vld.sshfl [vmem:[#allocation1] sm:$0xff pattern:$0x73625140] }
  0x93   :  { %v66_v28 = vsel %vm32_vm0, %v64_v27, 0.0 }
  0x94   :  { %67 = vadd.xlane.f32.xlu0 %v66_v28 }
 0x107   :  { %v68_v29 = vpop.xlane.xlu0 %67 }
 0x108   :  { %v69_v31 = vmul.f32 %v68_v29, %v42_v16 }
 0x10a   :  { %v70_v33 = vadd.f32 1e-05, %v69_v31 }
 0x10c   :  { %218 = vrsqrt.f32 %v70_v33  ;;  %vm77_vm3 = vweird.f32 %v70_v33 }
 0x10d   :  { %220 = vrcp.f32 %v251_v55 }
 0x112   :  { %v219_v34 = vpop.eup %218 }
 0x113   :  { %v72_v35 = vmul.f32 %v219_v34, %v70_v33  ;;  %vm78_vm2 = vweird.f32 %v219_v34  ;;  %v221_v56 = vpop.eup %220 }
 0x114   :  { %vm79_vm4 = vmor %vm77_vm3, %vm78_vm2  ;;  %v168_v57 = vmul.f32 2.0, %v221_v56  ;;  %vm172_vm7 = vweird.f32 %v221_v56 }
 0x115   :  { %v73_v36 = vmul.f32 %v219_v34, %v72_v35 }
 0x116   :  { %v169_v61 = vsub.f32 1.0, %v168_v57 }
 0x117   :  { %v74_v37 = vmul.f32 0.5, %v73_v36 }
 0x118   :  { %v170_v2 = vmul.f32 %v221_v56, %v169_v61 }
 0x119   :  { %v75_v38 = vsub.f32 1.5, %v74_v37 }
 0x11a   :  { %v171_v8 = vadd.f32 %v221_v56, %v170_v2 }
 0x11b   :  { %v76_v40 = vmul.f32 %v219_v34, %v75_v38 }
 0x11c   :  { %v173_v13 = vsel %vm172_vm7, %v221_v56, %v171_v8 }
 0x11d   :  { %v80_v42 = vsel %vm79_vm4, %v219_v34, %v76_v40 }
 0x11e   :  { %v85_v44 = vperm.slane %v80_v42, %v47_v17  ;;  %v89_v45 = vperm.slane %v80_v42, %v51_v18 }
 0x120   :  { %v92_v47 = vmul.f32 %v85_v44, %v55_v23  ;;  %v93_v48 = vmul.f32 %v89_v45, %v56_v24 }
 0x122   :  { %v99_v49 = vmul.f32 %v214_v39, %v92_v47  ;;  %v100_v50 = vmul.f32 %v97_v43, %v93_v48 }
 0x124   :  { %v106_v51 = vadd.f32 %v215_v41, %v99_v49  ;;  %v107_v52 = vadd.f32 %v104_v46, %v100_v50 }
 0x126   :  { %110 = vst [vmem:[#allocation1] ss:$4 sm:$0xff] %v106_v51 }
 0x127   :  { %112 = vst [vmem:[#allocation1 + $0x1] ss:$4 sm:$0xff] %v107_v52 }
 0x12e   :  { %v113_v53 = vld.sshfl [vmem:[#allocation1] sm:$0xff pattern:$0x73625140] }
 0x12f   :  { %v115_v54 = vpack.c.bf16 %v113_v53, %v113_v53 }
 0x131   :  { %206 = vmatmul.msk.bf16.vlgmr.msra.gmra.mxu0 %vm132_vm5, %v115_v54 }
 0x1ae   :  { %v145_v58 = vpop.f32.mrf.mxu0 }
 0x1af   :  { %v150_v59 = vrot.slane %v145_v58, 2  ;;  %v153_v60 = vsel %vm152_vm6, %v145_v58, 0.0 }
 0x1b0   :  { %v154_v62 = vrot.slane %v153_v60, 4 }
 0x1b1   :  { %v160_v63 = vsel %vm152_vm6, %v150_v59, 0.0 }
 0x1b2   :  { %v155_v0 = vadd.f32 %v154_v62, %v153_v60  ;;  %v161_v1 = vrot.slane %v160_v63, 4 }
 0x1b4   :  { %v156_v3 = vrot.slane %v155_v0, 2  ;;  %v162_v4 = vadd.f32 %v161_v1, %v160_v63 }
 0x1b6   :  { %v157_v5 = vadd.f32 %v156_v3, %v155_v0  ;;  %v163_v6 = vrot.slane %v162_v4, 2  ;;  %v147_v7 = vpop.f32.mrf.mxu0 }
 0x1b8   :  { %v158_v9 = vrot.slane %v157_v5, 1  ;;  %v164_v10 = vadd.f32 %v163_v6, %v162_v4 }
 0x1ba   :  { %v159_v11 = vadd.f32 %v158_v9, %v157_v5  ;;  %v165_v12 = vrot.slane %v164_v10, 1 }
 0x1bc   :  { %v166_v14 = vadd.f32 %v165_v12, %v164_v10  ;;  %v174_v15 = vmul.f32 %v173_v13, %v159_v11 }
 0x1be   :  { %v175_v16 = vmul.f32 %v173_v13, %v166_v14 }
 0x1c0   :  { %v179_v17 = vsel %vm178_vm8, %v175_v16, %v174_v15 }
 0x1c1   :  { %181 = vst [vmem:[#allocation2] sm:$0x3] %v179_v17 }
 0x1c2   :  { %192 = dma.vmem_to_hbm [thread:$0]  %s188_s2, 32, %s190_s27, [#allocation3]  }
 0x1c3   :  { %246 = dma.done.wait [#allocation3], 32  }
 0x1c4   :  { %247 = vsyncadd [#allocation3], 4294967264 }
 0x1c5   :  { %197 = vsyncpa [#allocation3], 1 }

// kernel: _forward.5
= control target key start
LH: loop header
LB: loop body
LE: loop exit
PB: predicated region body
PF: predicated region fallthrough
CT: control target
= control target key end

     0   :  { %s2622_s25 = smov 0   ;;  %s3246_s0 = inlined_call_operand.vmem [shape: bf16[4,8,32], index: 0, kind: input, shape index: {}, may-alias: {0,13}]   ;;  %s3247_s1 = inlined_call_operand.vmem [shape: f32[1,32], index: 1, kind: input, shape index: {}]   ;;  %s3248_s2 = inlined_call_operand.vmem [shape: f32[1,32], index: 2, kind: input, shape index: {}]   ;;  %s3249_s3 = inlined_call_operand.vmem [shape: bf16[32,96], index: 3, kind: input, shape index: {}]   ;;  %s3250_s4 = inlined_call_operand.vmem [shape: f32[1,96], index: 4, kind: input, shape index: {}]   ;;  %s3251_s5 = inlined_call_operand.vmem [shape: bf16[32,32], index: 5, kind: input, shape index: {}]   ;;  %s3252_s6 = inlined_call_operand.vmem [shape: f32[1,32], index: 6, kind: input, shape index: {}]   ;;  %s3253_s7 = inlined_call_operand.vmem [shape: f32[1,32], index: 7, kind: input, shape index: {}]   ;;  %s3254_s8 = inlined_call_operand.vmem [shape: f32[1,32], index: 8, kind: input, shape index: {}]   ;;  %s3255_s9 = inlined_call_operand.vmem [shape: bf16[32,128], index: 9, kind: input, shape index: {}]   ;;  %s3256_s10 = inlined_call_operand.vmem [shape: f32[1,128], index: 10, kind: input, shape index: {}]   ;;  %s3257_s11 = inlined_call_operand.vmem [shape: bf16[128,32], index: 11, kind: input, shape index: {}]   ;;  %s3258_s12 = inlined_call_operand.vmem [shape: f32[1,32], index: 12, kind: input, shape index: {}]   ;;  %s3259_s13 = inlined_call_operand.vmem [shape: bf16[4,8,32], index: 13, kind: output, shape index: {}, may-alias: {0,13}]  }
   0x1 LB: > { %s2295_s26 = sadd.s32 4294967295, %s2539_s25   ;;  %p2299_p0 = scmp.ge.s32.totalorder %s2539_s25, 1  ;;  %s2539_s25 = sphi %s2622_s25, %s23_s25  }
   0x2   : > { %p388_p1 = scmp.lt.s32.totalorder %s2539_s25, 3 }
   0x4   : > { %p389_p2 = pnand %p2299_p0, %p388_p1 }
   0x5   : > { %s2300_s27 = sshll.u32 (!%p389_p2), %s2295_s26, 1  ;;  %s2542_s26 = smov (!%p389_p2), 104  }
   0x6   : > { %392 = sbr.rel (%p389_p2) target bundleno = 2116 (0x844), region = 72  ;;  %p433_p3 = scmp.lt.s32.totalorder (!%p389_p2), %s2300_s27, 3 }
   0x7   : > { %s2543_s29 = smov (!%p389_p2), 120   ;;  %s2544_s30 = smov (!%p389_p2), 112  }
   0x8   : > { %s2548_s15 = smov (!%p389_p2), 64   ;;  %s2549_s16 = smov (!%p389_p2), 16  }
   0x9   : > { %s2550_s17 = smov (!%p389_p2), 24   ;;  %s2551_s18 = smov (!%p389_p2), 8  }
   0xb   : > { %s3261_s27 = smov (!%p433_p3, %s2300_s27), 3  ;;  %vm451_vm0 = vcmask 261120   ;;  %v2541_v5 = vmov 32.0   ;;  %v2384_v22 = vld [vmem:[%s3249_s3 + $0x8] sm:$0xff]  ;;  %v2383_v24 = vld [vmem:[%s3249_s3] sm:$0xff]  ;;  %vm572_vm8 = vcmask 1047556  }
   0xc   : > { %s2301_s28 = sshll.u32 %s3261_s27, 2  ;;  %2483 = vrcp.f32 %v2541_v5  ;;  %543 = vmatpush.bf16.msra.mxu0 %v2384_v22  ;;  %v2475_v43 = vld [vmem:[%s3247_s1] ss:$0 sm:$0xff]  ;;  %v2546_v61 = vmov 1983009808   ;;  %vm1304_vm9 = vcmask 64512  }
   0xd   : > { %s436_s14 = scalar_lea.vmem %s3246_s0, %s2301_s28  ;;  %v2476_v48 = vld [vmem:[%s3248_s2] ss:$0 sm:$0xff]  ;;  %v577_v62 = vunpack.c.l.s4 %v2546_v61  ;;  %vm1569_vm11 = vcmask 1043456   ;;  %vm1965_vm12 = vcmask 130048   ;;  %vm1968_vm13 = vcmask 195584  }
   0xe   : > { %v2398_v0 = vld [vmem:[%s436_s14] sm:$0xff]   ;;  %s2545_s14 = smov 96  }
   0xf   : > { %v2638_v1 = vunpack.c.l.bf16 %v2398_v0  ;;  %v2642_v3 = vunpack.c.h.bf16 %v2398_v0  ;;  %v2477_v53 = vld [vmem:[%s3250_s4] ss:$0 sm:$0xff] }
  0x10   : > { %544 = vmatpush.bf16.msra.mxu0 %v2383_v24 }
  0x11   : > { %v452_v2 = vsel %vm451_vm0, %v2638_v1, 0.0  ;;  %v455_v4 = vsel %vm451_vm0, %v2642_v3, 0.0 }
  0x12   : > { %453 = vadd.xlane.f32.xlu0 %v452_v2  ;;  %v2484_v6 = vpop.eup %2483 }
  0x13   : > { %v459_v7 = vmul.f32 32.0, %v2484_v6  ;;  %vm463_vm1 = vweird.f32 %v2484_v6 }
  0x15   : > { %v460_v8 = vsub.f32 1.0, %v459_v7  ;;  %v2547_v7 = vmov 1934713408  }
  0x17   : > { %v461_v9 = vmul.f32 %v2484_v6, %v460_v8  ;;  %v601_v8 = vunpack.c.l.s4 %v2547_v7 }
  0x19   : > { %v462_v10 = vadd.f32 %v2484_v6, %v461_v9 }
  0x1a   : > { %456 = vadd.xlane.f32.xlu0 %v455_v4  ;;  %v2683_v4 = vunpack.c.0.s8 %v577_v62 }
  0x1b   : > { %v2646_v11 = vsel %vm463_vm1, %v2484_v6, %v462_v10 }
  0x85   : > { %v454_v12 = vpop.xlane.xlu0 %453 }
  0x86   : > { %v465_v13 = vmul.f32 %v2646_v11, %v454_v12 }
  0x88   : > { %v467_v14 = vsub.f32 %v2638_v1, %v465_v13 }
  0x8a   : > { %v469_v15 = vmul.f32 %v467_v14, %v467_v14 }
  0x8c   : > { %v471_v16 = vsel %vm451_vm0, %v469_v15, 0.0  ;;  %v2691_v15 = vunpack.c.0.s8 %v601_v8 }
  0x8d   : > { %472 = vadd.xlane.f32.xlu1 %v471_v16  ;;  %v457_v17 = vpop.xlane.xlu0 %456 }
  0x8e   : > { %v466_v18 = vmul.f32 %v2646_v11, %v457_v17 }
  0x90   : > { %v468_v19 = vsub.f32 %v2642_v3, %v466_v18 }
  0x92   : > { %v470_v20 = vmul.f32 %v468_v19, %v468_v19 }
  0x94   : > { %v474_v21 = vsel %vm451_vm0, %v470_v20, 0.0 }
  0x95   : > { %475 = vadd.xlane.f32.xlu1 %v474_v21 }
 0x100   : > { %v473_v23 = vpop.xlane.xlu1 %472 }
 0x101   : > { %v477_v25 = vmul.f32 %v473_v23, %v2646_v11 }
 0x103   : > { %v479_v26 = vadd.f32 1e-05, %v477_v25 }
 0x105   : > { %2485 = vrsqrt.f32 %v479_v26  ;;  %vm487_vm3 = vweird.f32 %v479_v26 }
 0x108   : > { %v476_v27 = vpop.xlane.xlu1 %475 }
 0x109   : > { %v478_v28 = vmul.f32 %v476_v27, %v2646_v11 }
 0x10b   : > { %v2486_v29 = vpop.eup %2485  ;;  %v480_v30 = vadd.f32 1e-05, %v478_v28 }
 0x10c   : > { %v482_v31 = vmul.f32 %v2486_v29, %v479_v26  ;;  %vm488_vm2 = vweird.f32 %v2486_v29 }
 0x10d   : > { %2487 = vrsqrt.f32 %v480_v30  ;;  %vm489_vm4 = vmor %vm487_vm3, %vm488_vm2  ;;  %vm497_vm6 = vweird.f32 %v480_v30 }
 0x10e   : > { %v483_v32 = vmul.f32 %v2486_v29, %v482_v31 }
 0x110   : > { %v484_v33 = vmul.f32 0.5, %v483_v32 }
 0x112   : > { %v485_v34 = vsub.f32 1.5, %v484_v33 }
 0x113   : > { %v2488_v35 = vpop.eup %2487 }
 0x114   : > { %v486_v36 = vmul.f32 %v2486_v29, %v485_v34  ;;  %v492_v37 = vmul.f32 %v2488_v35, %v480_v30  ;;  %vm498_vm5 = vweird.f32 %v2488_v35 }
 0x115   : > { %vm499_vm7 = vmor %vm497_vm6, %vm498_vm5 }
 0x116   : > { %v493_v38 = vmul.f32 %v2488_v35, %v492_v37  ;;  %v490_v39 = vsel %vm489_vm4, %v2486_v29, %v486_v36 }
 0x117   : > { %v501_v42 = vmul.f32 %v490_v39, %v467_v14 }
 0x118   : > { %v494_v40 = vmul.f32 0.5, %v493_v38 }
 0x119   : > { %v506_v47 = vmul.f32 %v2475_v43, %v501_v42 }
 0x11a   : > { %v495_v41 = vsub.f32 1.5, %v494_v40 }
 0x11b   : > { %v511_v50 = vadd.f32 %v2476_v48, %v506_v47 }
 0x11c   : > { %v496_v44 = vmul.f32 %v2488_v35, %v495_v41 }
 0x11e   : > { %v500_v45 = vsel %vm499_vm7, %v2488_v35, %v496_v44 }
 0x11f   : > { %v502_v46 = vmul.f32 %v500_v45, %v468_v19 }
 0x121   : > { %v507_v49 = vmul.f32 %v2475_v43, %v502_v46 }
 0x123   : > { %v512_v51 = vadd.f32 %v2476_v48, %v507_v49 }
 0x125   : > { %v513_v52 = vpack.c.bf16 %v512_v51, %v511_v50 }
 0x127   : > { %2312 = vmatmul.msk.bf16.vlgmr.msra.gmra.mxu0 %vm451_vm0, %v513_v52 }
 0x1a4   : > { %v546_v54 = vpop.f32.mrf.mxu0 }
 0x1a5   : > { %v547_v55 = vadd.f32 %v2477_v53, %v546_v54 }
 0x1a7   : > { %565 = vrot.lane.b32.xlu0 %v547_v55, %s2542_s26  ;;  %553 = vrot.lane.b32.xlu2 %v547_v55, %s2543_s29  ;;  %v574_v2 = vrot.slane %v547_v55, 4 }
 0x1ac   : > { %v548_v56 = vpop.f32.mrf.mxu0 }
 0x1ad   : > { %v2672_v57 = vadd.f32 %v2477_v53, %v548_v56 }
 0x1af   : > { %555 = vrot.lane.b32.xlu1 %v2672_v57, %s2543_s29  ;;  %559 = vrot.lane.b32.xlu2 %v547_v55, %s2544_s30 }
 0x1b7   : > { %561 = vrot.lane.b32.xlu2 %v2672_v57, %s2544_s30  ;;  %s442_s30 = scalar_lea.vmem %s3259_s13, %s2301_s28 }
 0x1bf   : > { %567 = vrot.lane.b32.xlu2 %v2672_v57, %s2542_s26 }
 0x201   : > { %v554_v58 = vpop.permute.xlu2 %553 }
 0x202   : > { %v2677_v59 = vpack.i.bf16 %v554_v58, %v547_v55  ;;  %v586_v10 = vrot.slane %v554_v58, 4 }
 0x204   : > { %2421 = vrot.lane.b32.xlu2 %v2677_v59, %s2545_s14 }
 0x209   : > { %v560_v60 = vpop.permute.xlu2 %559 }
 0x20a   : > { %v571_v0 = vrot.slane %v560_v60, 4  ;;  %v575_v5 = vsel %vm572_vm8, %v560_v60, %v574_v2 }
 0x20b   : > { %v583_v9 = vperm.slane %v575_v5, %v2683_v4 }
 0x20c   : > { %v573_v6 = vsel %vm572_vm8, %v571_v0, %v547_v55 }
 0x20d   : > { %v579_v12 = vperm.slane %v573_v6, %v2683_v4  ;;  %v610_v19 = vrot.slane %v583_v9, 4 }
 0x20f   : > { %v598_v23 = vrot.slane %v579_v12, 4 }
 0x211   : > { %v2681_v63 = vpop.permute.xlu2 %561 }
 0x219   : > { %v566_v13 = vpop.permute.xlu0 %565  ;;  %v2689_v14 = vpop.permute.xlu2 %567 }
 0x21a   : > { %v584_v16 = vrot.slane %v566_v13, 4  ;;  %v587_v17 = vsel %vm572_vm8, %v566_v13, %v586_v10  ;;  %v2694_v18 = vpack.i.bf16 %v566_v13, %v560_v60  ;;  %v2699_v21 = vpack.i.bf16 %v2689_v14, %v2681_v63 }
 0x21b   : > { %v595_v20 = vperm.slane %v587_v17, %v2683_v4 }
 0x21c   : > { %v585_v22 = vsel %vm572_vm8, %v584_v16, %v554_v58  ;;  %2426 = vrot.lane.b32.xlu0 %v2694_v18, %s2545_s14  ;;  %2436 = vrot.lane.b32.xlu1 %v2699_v21, %s2545_s14 }
 0x21d   : > { %v591_v24 = vperm.slane %v585_v22, %v2683_v4  ;;  %v608_v25 = vrot.slane %v595_v20, 4  ;;  %v611_v26 = vsel %vm572_vm8, %v595_v20, %v610_v19  ;;  %v628_v22 = vrot.slane %v2681_v63, 4 }
 0x21e   : > { %v619_v27 = vperm.slane %v611_v26, %v2691_v15 }
 0x21f   : > { %v596_v28 = vrot.slane %v591_v24, 4  ;;  %v599_v29 = vsel %vm572_vm8, %v591_v24, %v598_v23  ;;  %v609_v30 = vsel %vm572_vm8, %v608_v25, %v583_v9  ;;  %v630_v23 = vrot.slane %v2672_v57, 4 }
 0x220   : > { %v607_v31 = vperm.slane %v599_v29, %v2691_v15  ;;  %v615_v32 = vperm.slane %v609_v30, %v2691_v15  ;;  %v626_v33 = vrot.slane %v619_v27, 4  ;;  %v640_v25 = vrot.slane %v2689_v14, 4 }
 0x221   : > { %v597_v34 = vsel %vm572_vm8, %v596_v28, %v579_v12  ;;  %v556_v35 = vpop.permute.xlu1 %555  ;;  %v629_v26 = vsel %vm572_vm8, %v628_v22, %v2672_v57  ;;  %v631_v27 = vsel %vm572_vm8, %v2681_v63, %v630_v23 }
 0x222   : > { %v603_v36 = vperm.slane %v597_v34, %v2691_v15  ;;  %v622_v37 = vrot.slane %v607_v31, 4  ;;  %v624_v38 = vrot.slane %v615_v32, 4  ;;  %v627_v39 = vsel %vm572_vm8, 0.0, %v626_v33 }
 0x223   : > { %v695_v40 = vsel %vm572_vm8, %v626_v33, %v615_v32  ;;  %v700_v41 = vrot.slane %v627_v39, 4  ;;  %v2720_v44 = vpack.i.bf16 %v556_v35, %v2672_v57  ;;  %v642_v24 = vrot.slane %v556_v35, 4 }
 0x224   : > { %v623_v42 = vsel %vm572_vm8, 0.0, %v622_v37  ;;  %v625_v43 = vsel %vm572_vm8, 0.0, %v624_v38  ;;  %v620_v46 = vrot.slane %v603_v36, 4  ;;  %v684_v47 = vsel %vm572_vm8, %v622_v37, %v603_v36 }
 0x225   : > { %v689_v45 = vrot.slane %v623_v42, 4  ;;  %2431 = vrot.lane.b32.xlu2 %v2720_v44, %s2545_s14  ;;  %v688_v48 = vperm.slane %v684_v47, %v2683_v4  ;;  %v699_v50 = vperm.slane %v695_v40, %v2683_v4  ;;  %v701_v51 = vsel %vm572_vm8, %v700_v41, %v625_v43 }
 0x226   : > { %v621_v49 = vsel %vm572_vm8, 0.0, %v620_v46  ;;  %v705_v54 = vperm.slane %v701_v51, %v2683_v4  ;;  %v641_v28 = vsel %vm572_vm8, %v640_v25, %v556_v35  ;;  %v643_v29 = vsel %vm572_vm8, %v2689_v14, %v642_v24 }
 0x227   : > { %v690_v52 = vsel %vm572_vm8, %v689_v45, %v621_v49  ;;  %v708_v55 = vrot.slane %v688_v48, 4  ;;  %v720_v56 = vrot.slane %v699_v50, 4  ;;  %v635_v30 = vperm.slane %v629_v26, %v2683_v4 }
 0x228   : > { %v694_v53 = vperm.slane %v690_v52, %v2683_v4  ;;  %v718_v2 = vrot.slane %v705_v54, 4  ;;  %v639_v31 = vperm.slane %v631_v27, %v2683_v4  ;;  %v647_v32 = vperm.slane %v641_v28, %v2683_v4 }
 0x229   : > { %v721_v60 = vsel %vm572_vm8, %v705_v54, %v720_v56  ;;  %v651_v33 = vperm.slane %v643_v29, %v2683_v4  ;;  %v654_v34 = vrot.slane %v635_v30, 4 }
 0x22a   : > { %v709_v58 = vsel %vm572_vm8, %v694_v53, %v708_v55  ;;  %v729_v62 = vperm.slane %v721_v60, %v2691_v15  ;;  %v706_v0 = vrot.slane %v694_v53, 4  ;;  %v719_v8 = vsel %vm572_vm8, %v718_v2, %v699_v50 }
 0x22b   : > { %v717_v61 = vperm.slane %v709_v58, %v2691_v15  ;;  %v725_v12 = vperm.slane %v719_v8, %v2691_v15  ;;  %v666_v36 = vrot.slane %v639_v31, 4  ;;  %v652_v37 = vrot.slane %v647_v32, 4 }
 0x22c   : > { %v734_v5 = vrot.slane %v729_v62, 4  ;;  %v707_v7 = vsel %vm572_vm8, %v706_v0, %v688_v48  ;;  %v655_v57 = vsel %vm572_vm8, %v647_v32, %v654_v34  ;;  %v664_v38 = vrot.slane %v651_v33, 4 }
 0x22d   : > { %v736_v6 = vrot.slane %v717_v61, 4  ;;  %v713_v10 = vperm.slane %v707_v7, %v2691_v15  ;;  %v730_v16 = vrot.slane %v725_v12, 4  ;;  %v667_v63 = vsel %vm572_vm8, %v651_v33, %v666_v36 }
 0x22e   : > { %v2739_v9 = vsel %vm572_vm8, %v734_v5, %v717_v61  ;;  %v653_v35 = vsel %vm572_vm8, %v652_v37, %v635_v30  ;;  %v663_v14 = vperm.slane %v655_v57, %v2691_v15  ;;  %v675_v39 = vperm.slane %v667_v63, %v2691_v15 }
 0x22f   : > { %v2744_v13 = vsel %vm572_vm8, %v729_v62, %v736_v6  ;;  %v732_v17 = vrot.slane %v713_v10, 4  ;;  %v2747_v19 = vsel %vm572_vm8, %v730_v16, %v713_v10  ;;  %v665_v40 = vsel %vm572_vm8, %v664_v38, %v639_v31 }
 0x230   : > { %v659_v42 = vperm.slane %v653_v35, %v2691_v15  ;;  %v671_v43 = vperm.slane %v665_v40, %v2691_v15  ;;  %v678_v45 = vrot.slane %v663_v14, 4  ;;  %v682_v46 = vrot.slane %v675_v39, 4 }
 0x231   : > { %v2750_v20 = vsel %vm572_vm8, %v725_v12, %v732_v17 }
 0x232   : > { %v676_v47 = vrot.slane %v659_v42, 4  ;;  %v679_v48 = vsel %vm572_vm8, 0.0, %v678_v45  ;;  %v680_v49 = vrot.slane %v671_v43, 4  ;;  %v683_v50 = vsel %vm572_vm8, 0.0, %v682_v46 }
 0x233   : > { %v738_v53 = vsel %vm572_vm8, %v678_v45, %v659_v42  ;;  %v743_v54 = vrot.slane %v679_v48, 4  ;;  %v754_v55 = vrot.slane %v683_v50, 4  ;;  %v749_v58 = vsel %vm572_vm8, %v682_v46, %v671_v43 }
 0x234   : > { %v677_v52 = vsel %vm572_vm8, 0.0, %v676_v47  ;;  %v681_v56 = vsel %vm572_vm8, 0.0, %v680_v49  ;;  %v2781_v2 = vperm.slane %v738_v53, %v2683_v4  ;;  %v2787_v7 = vperm.slane %v749_v58, %v2683_v4 }
 0x235   : > { %v2784_v6 = vsel %vm572_vm8, %v743_v54, %v677_v52  ;;  %v2790_v8 = vsel %vm572_vm8, %v754_v55, %v681_v56 }
 0x25e   : > { %v2422_v41 = vpop.permute.xlu2 %2421 }
 0x25f   : > { %v2424_v60 = vunpack.i.h.bf16 %v2422_v41  ;;  %v2423_v61 = vunpack.i.l.bf16 %v2422_v41 }
 0x261   : > { %v838_v10 = vrot.slane %v2424_v60, 4  ;;  %v826_v12 = vrot.slane %v2423_v61, 4 }
 0x27f   : > { %v2432_v51 = vpop.permute.xlu2 %2431 }
 0x280   : > { %v2434_v62 = vunpack.i.h.bf16 %v2432_v51  ;;  %v2433_v0 = vunpack.i.l.bf16 %v2432_v51 }
 0x282   : > { %v894_v23 = vrot.slane %v2434_v62, 4  ;;  %v882_v24 = vrot.slane %v2433_v0, 4 }
 0x28e   : > { %v2427_v5 = vpop.permute.xlu0 %2426  ;;  %v2437_v22 = vpop.permute.xlu1 %2436 }
 0x28f   : > { %v2429_v16 = vunpack.i.h.bf16 %v2427_v5  ;;  %v2428_v17 = vunpack.i.l.bf16 %v2427_v5  ;;  %v2439_v25 = vunpack.i.h.bf16 %v2437_v22  ;;  %v2438_v26 = vunpack.i.l.bf16 %v2437_v22 }
 0x291   : > { %v836_v27 = vrot.slane %v2429_v16, 4  ;;  %v824_v28 = vrot.slane %v2428_v17, 4  ;;  %v827_v29 = vsel %vm572_vm8, %v2428_v17, %v826_v12  ;;  %v839_v30 = vsel %vm572_vm8, %v2429_v16, %v838_v10 }
 0x292   : > { %v835_v31 = vperm.slane %v827_v29, %v2683_v4  ;;  %v847_v32 = vperm.slane %v839_v30, %v2683_v4  ;;  %v892_v33 = vrot.slane %v2439_v25, 4  ;;  %v880_v34 = vrot.slane %v2438_v26, 4 }
 0x293   : > { %v825_v36 = vsel %vm572_vm8, %v824_v28, %v2423_v61  ;;  %v837_v37 = vsel %vm572_vm8, %v836_v27, %v2424_v60  ;;  %v883_v57 = vsel %vm572_vm8, %v2438_v26, %v882_v24  ;;  %v895_v38 = vsel %vm572_vm8, %v2439_v25, %v894_v23 }
 0x294   : > { %v831_v63 = vperm.slane %v825_v36, %v2683_v4  ;;  %v843_v35 = vperm.slane %v837_v37, %v2683_v4  ;;  %v860_v14 = vrot.slane %v847_v32, 4  ;;  %v862_v39 = vrot.slane %v835_v31, 4 }
 0x295   : > { %v881_v40 = vsel %vm572_vm8, %v880_v34, %v2433_v0  ;;  %v891_v41 = vperm.slane %v883_v57, %v2683_v4  ;;  %v893_v42 = vsel %vm572_vm8, %v892_v33, %v2434_v62  ;;  %v903_v43 = vperm.slane %v895_v38, %v2683_v4 }
 0x296   : > { %v848_v45 = vrot.slane %v843_v35, 4  ;;  %v850_v46 = vrot.slane %v831_v63, 4  ;;  %v861_v47 = vsel %vm572_vm8, %v860_v14, %v835_v31  ;;  %v863_v48 = vsel %vm572_vm8, %v847_v32, %v862_v39 }
 0x297   : > { %v867_v49 = vperm.slane %v861_v47, %v2691_v15  ;;  %v871_v50 = vperm.slane %v863_v48, %v2691_v15  ;;  %v887_v51 = vperm.slane %v881_v40, %v2683_v4  ;;  %v899_v52 = vperm.slane %v893_v42, %v2683_v4 }
 0x298   : > { %v849_v53 = vsel %vm572_vm8, %v848_v45, %v831_v63  ;;  %v851_v54 = vsel %vm572_vm8, %v843_v35, %v850_v46  ;;  %v916_v55 = vrot.slane %v903_v43, 4  ;;  %v918_v56 = vrot.slane %v891_v41, 4 }
 0x299   : > { %v855_v58 = vperm.slane %v849_v53, %v2691_v15  ;;  %v859_v60 = vperm.slane %v851_v54, %v2691_v15  ;;  %v876_v61 = vrot.slane %v867_v49, 4  ;;  %v878_v62 = vrot.slane %v871_v50, 4 }
 0x29a   : > { %v904_v0 = vrot.slane %v899_v52, 4  ;;  %v906_v5 = vrot.slane %v887_v51, 4  ;;  %v917_v10 = vsel %vm572_vm8, %v916_v55, %v891_v41  ;;  %v919_v12 = vsel %vm572_vm8, %v903_v43, %v918_v56 }
 0x29b   : > { %v872_v16 = vrot.slane %v855_v58, 4  ;;  %v874_v17 = vrot.slane %v859_v60, 4  ;;  %v877_v22 = vsel %vm572_vm8, 0.0, %v876_v61  ;;  %v879_v23 = vsel %vm572_vm8, 0.0, %v878_v62 }
 0x29c   : > { %v952_v24 = vrot.slane %v879_v23, 4  ;;  %v905_v25 = vsel %vm572_vm8, %v904_v0, %v887_v51  ;;  %v907_v26 = vsel %vm572_vm8, %v899_v52, %v906_v5  ;;  %v923_v27 = vperm.slane %v917_v10, %v2691_v15 }
 0x29d   : > { %v875_v28 = vsel %vm572_vm8, 0.0, %v874_v17  ;;  %v911_v29 = vperm.slane %v905_v25, %v2691_v15  ;;  %v915_v30 = vperm.slane %v907_v26, %v2691_v15  ;;  %v927_v31 = vperm.slane %v919_v12, %v2691_v15 }
 0x29e   : > { %v932_v32 = vrot.slane %v923_v27, 4  ;;  %v873_v33 = vsel %vm572_vm8, 0.0, %v872_v16  ;;  %v936_v34 = vsel %vm572_vm8, %v874_v17, %v855_v58  ;;  %v941_v36 = vrot.slane %v875_v28, 4 }
 0x29f   : > { %v928_v37 = vrot.slane %v911_v29, 4  ;;  %v930_v57 = vrot.slane %v915_v30, 4  ;;  %v934_v38 = vrot.slane %v927_v31, 4  ;;  %v940_v63 = vperm.slane %v936_v34, %v2683_v4 }
 0x2a0   : > { %v933_v35 = vsel %vm572_vm8, 0.0, %v932_v32  ;;  %v942_v14 = vsel %vm572_vm8, %v941_v36, %v873_v33  ;;  %v947_v39 = vsel %vm572_vm8, %v878_v62, %v867_v49  ;;  %v953_v40 = vsel %vm572_vm8, %v952_v24, %v877_v22 }
 0x2a1   : > { %v931_v41 = vsel %vm572_vm8, 0.0, %v930_v57  ;;  %v935_v42 = vsel %vm572_vm8, 0.0, %v934_v38  ;;  %v1001_v43 = vsel %vm572_vm8, %v934_v38, %v923_v27  ;;  %v946_v45 = vperm.slane %v942_v14, %v2683_v4 }
 0x2a2   : > { %v995_v46 = vrot.slane %v931_v41, 4  ;;  %v1006_v47 = vrot.slane %v935_v42, 4  ;;  %v951_v48 = vperm.slane %v947_v39, %v2683_v4  ;;  %v957_v50 = vperm.slane %v953_v40, %v2683_v4 }
 0x2a3   : > { %v960_v51 = vrot.slane %v940_v63, 4  ;;  %v929_v49 = vsel %vm572_vm8, 0.0, %v928_v37  ;;  %v990_v52 = vsel %vm572_vm8, %v930_v57, %v911_v29  ;;  %v1005_v53 = vperm.slane %v1001_v43, %v2683_v4 }
 0x2a4   : > { %v972_v54 = vrot.slane %v951_v48, 4  ;;  %v994_v55 = vperm.slane %v990_v52, %v2683_v4  ;;  %v996_v56 = vsel %vm572_vm8, %v995_v46, %v929_v49  ;;  %v1007_v58 = vsel %vm572_vm8, %v1006_v47, %v933_v35 }
 0x2a5   : > { %v961_v60 = vsel %vm572_vm8, %v946_v45, %v960_v51  ;;  %v1000_v61 = vperm.slane %v996_v56, %v2683_v4  ;;  %v1011_v62 = vperm.slane %v1007_v58, %v2683_v4  ;;  %v1026_v0 = vrot.slane %v1005_v53, 4 }
 0x2a6   : > { %v969_v5 = vperm.slane %v961_v60, %v2691_v15  ;;  %v973_v10 = vsel %vm572_vm8, %v957_v50, %v972_v54  ;;  %v1014_v12 = vrot.slane %v994_v55, 4  ;;  %v958_v16 = vrot.slane %v946_v45, 4 }
 0x2a7   : > { %v981_v17 = vperm.slane %v973_v10, %v2691_v15  ;;  %v1027_v22 = vsel %vm572_vm8, %v1011_v62, %v1026_v0  ;;  %v970_v23 = vrot.slane %v957_v50, 4  ;;  %v1012_v24 = vrot.slane %v1000_v61, 4 }
 0x2a8   : > { %v1015_v25 = vsel %vm572_vm8, %v1000_v61, %v1014_v12  ;;  %v1035_v26 = vperm.slane %v1027_v22, %v2691_v15  ;;  %v959_v27 = vsel %vm572_vm8, %v958_v16, %v940_v63  ;;  %v988_v28 = vrot.slane %v969_v5, 4 }
 0x2a9   : > { %v986_v29 = vrot.slane %v981_v17, 4  ;;  %v1023_v30 = vperm.slane %v1015_v25, %v2691_v15  ;;  %v965_v31 = vperm.slane %v959_v27, %v2691_v15  ;;  %v971_v32 = vsel %vm572_vm8, %v970_v23, %v951_v48 }
 0x2aa   : > { %v1040_v33 = vrot.slane %v1035_v26, 4  ;;  %v977_v34 = vperm.slane %v971_v32, %v2691_v15  ;;  %v989_v36 = vsel %vm572_vm8, %v981_v17, %v988_v28  ;;  %v1013_v37 = vsel %vm572_vm8, %v1012_v24, %v994_v55 }
 0x2ab   : > { %v987_v57 = vsel %vm572_vm8, %v986_v29, %v969_v5  ;;  %v1042_v38 = vrot.slane %v1023_v30, 4  ;;  %v1047_v35 = vpack.c.bf16 %v989_v36, %v989_v36  ;;  %v1019_v63 = vperm.slane %v1013_v37, %v2691_v15 }
 0x2ac   : > { %v1046_v14 = vpack.c.bf16 %v987_v57, %v987_v57  ;;  %v1041_v39 = vsel %vm572_vm8, %v1040_v33, %v1023_v30  ;;  %v982_v40 = vrot.slane %v977_v34, 4  ;;  %v1024_v41 = vrot.slane %v1011_v62, 4 }
 0x2ad   : > { %v1050_v42 = vpack.c.bf16 %v1041_v39, %v1041_v39  ;;  %v1366_v43 = vsel %vm1304_vm9, %v1047_v35, 0  ;;  %v1043_v45 = vsel %vm572_vm8, %v1035_v26, %v1042_v38  ;;  %v984_v46 = vrot.slane %v965_v31, 4 }
 0x2ae   : > { %v1347_v47 = vsel %vm1304_vm9, %v1046_v14, 0  ;;  %v983_v48 = vsel %vm572_vm8, %v982_v40, %v965_v31  ;;  %1375 = vmatpush.bf16.xpose.msrb.mxu0 %v1366_v43  ;;  %v1025_v50 = vsel %vm572_vm8, %v1024_v41, %v1005_v53  ;;  %v1051_v51 = vpack.c.bf16 %v1043_v45, %v1043_v45 }
 0x2af   : > { %1356 = vmatpush.bf16.xpose.msra.mxu3 %v1347_v47  ;;  %v1423_v49 = vsel %vm1304_vm9, %v1050_v42, 0  ;;  %v1044_v52 = vpack.c.bf16 %v983_v48, %v983_v48  ;;  %v1031_v54 = vperm.slane %v1025_v50, %v2691_v15  ;;  %v985_v55 = vsel %vm572_vm8, %v977_v34, %v984_v46 }
 0x2b0   : > { %v1442_v56 = vsel %vm1304_vm9, %v1051_v51, 0  ;;  %v1045_v58 = vpack.c.bf16 %v985_v55, %v985_v55  ;;  %v1038_v60 = vrot.slane %v1019_v63, 4  ;;  %v748_v61 = vperm.slane %v2784_v6, %v2683_v4 }
 0x2b1   : > { %v1309_v62 = vsel %vm1304_vm9, %v1044_v52, 0  ;;  %v1036_v53 = vrot.slane %v1031_v54, 4  ;;  %v759_v0 = vperm.slane %v2790_v8, %v2683_v4  ;;  %v762_v5 = vrot.slane %v2781_v2, 4 }
 0x2b2   : > { %1318 = vmatpush.bf16.xpose.msra.mxu1 %v1309_v62  ;;  %v1328_v10 = vsel %vm1304_vm9, %v1045_v58, 0  ;;  %v1039_v12 = vsel %vm572_vm8, %v1031_v54, %v1038_v60  ;;  %v774_v16 = vrot.slane %v2787_v7, 4  ;;  %v795_v22 = vpack.c.bf16 %v2744_v13, %v2744_v13 }
 0x2b3   : > { %v1037_v17 = vsel %vm572_vm8, %v1036_v53, %v1019_v63  ;;  %1337 = vmatpush.bf16.xpose.msra.mxu2 %v1328_v10  ;;  %v1049_v6 = vpack.c.bf16 %v1039_v12, %v1039_v12  ;;  %v794_v8 = vpack.c.bf16 %v2739_v9, %v2739_v9  ;;  %v763_v25 = vsel %vm572_vm8, %v748_v61, %v762_v5 }
 0x2b4   : > { %v1048_v23 = vpack.c.bf16 %v1037_v17, %v1037_v17  ;;  %v772_v26 = vrot.slane %v759_v0, 4  ;;  %v775_v28 = vsel %vm572_vm8, %v759_v0, %v774_v16  ;;  %v760_v29 = vrot.slane %v748_v61, 4 }
 0x2b5   : > { %v1404_v24 = vsel %vm1304_vm9, %v1049_v6, 0  ;;  %2316 = vmatmul.msk.bf16.vlgmr.msrb.gmra.mxu0 %vm1304_vm9, %v795_v22  ;;  %v792_v13 = vpack.c.bf16 %v2747_v19, %v2747_v19  ;;  %v793_v9 = vpack.c.bf16 %v2750_v20, %v2750_v20  ;;  %v771_v30 = vperm.slane %v763_v25, %v2691_v15 }
 0x2b6   : > { %1451 = vmatpush.bf16.xpose.msra.mxu0 %v1442_v56  ;;  %v1385_v27 = vsel %vm1304_vm9, %v1048_v23, 0  ;;  %2315 = vmatmul.msk.bf16.vlgmr.msra.gmra.mxu3 %vm1304_vm9, %v794_v8  ;;  %v783_v31 = vperm.slane %v775_v28, %v2691_v15  ;;  %v773_v32 = vsel %vm572_vm8, %v772_v26, %v2787_v7  ;;  %v761_v33 = vsel %vm572_vm8, %v760_v29, %v2781_v2 }
 0x2b7   : > { %1432 = vmatpush.bf16.xpose.msrb.mxu3 %v1423_v49  ;;  %v790_v34 = vrot.slane %v771_v30, 4  ;;  %v779_v19 = vperm.slane %v773_v32, %v2691_v15  ;;  %v767_v20 = vperm.slane %v761_v33, %v2691_v15  ;;  %v1457_v41 = vlaneseq }
 0x2b8   : > { %v788_v36 = vrot.slane %v783_v31, 4 }
 0x2b9   : > { %2313 = vmatmul.msk.bf16.vlgmr.msra.gmra.mxu1 %vm1304_vm9, %v792_v13  ;;  %v784_v37 = vrot.slane %v779_v19, 4  ;;  %v791_v57 = vsel %vm572_vm8, %v783_v31, %v790_v34  ;;  %v786_v35 = vrot.slane %v767_v20, 4  ;;  %v1458_v42 = vand.u32 127, %v1457_v41 }
 0x2ba   : > { %1394 = vmatpush.bf16.xpose.msrb.mxu1 %v1385_v27  ;;  %2314 = vmatmul.msk.bf16.vlgmr.msra.gmra.mxu2 %vm1304_vm9, %v793_v9  ;;  %v789_v38 = vsel %vm572_vm8, %v788_v36, %v771_v30  ;;  %v799_v63 = vpack.c.bf16 %v791_v57, %v791_v57 }
 0x2bb   : > { %1413 = vmatpush.bf16.xpose.msrb.mxu2 %v1404_v24  ;;  %v798_v14 = vpack.c.bf16 %v789_v38, %v789_v38  ;;  %v785_v7 = vsel %vm572_vm8, %v784_v37, %v767_v20  ;;  %v787_v2 = vsel %vm572_vm8, %v779_v19, %v786_v35  ;;  %vm1459_vm10 = vcmp.lt.s32.totalorder %v1458_v42, 5 }
 0x2bc   : > { %v796_v39 = vpack.c.bf16 %v785_v7, %v785_v7  ;;  %v797_v40 = vpack.c.bf16 %v787_v2, %v787_v2 }
 0x2c5   : > { %2320 = vmatmul.msk.bf16.vlgmr.msra.gmra.mxu0 %vm1304_vm9, %v799_v63 }
 0x2c6   : > { %2319 = vmatmul.msk.bf16.vlgmr.msrb.gmra.mxu3 %vm1304_vm9, %v798_v14 }
 0x2c9   : > { %2317 = vmatmul.msk.bf16.vlgmr.msrb.gmra.mxu1 %vm1304_vm9, %v796_v39 }
 0x2ca   : > { %2318 = vmatmul.msk.bf16.vlgmr.msrb.gmra.mxu2 %vm1304_vm9, %v797_v40 }
 0x332   : > { %v1377_v43 = vpop.f32.mrf.mxu0 }
 0x333   : > { %v1465_v45 = vsel %vm1459_vm10, %v1377_v43, -1e+30 }
 0x334   : > { %v1479_v46 = vsel %vm1304_vm9, %v1465_v45, -inf }
 0x335   : > { %1480 = vmax.xlane.f32.xlu0 %v1479_v46 }
 0x336   : > { %v1320_v47 = vpop.f32.mrf.mxu1 }
 0x337   : > { %v1462_v48 = vsel %vm1459_vm10, %v1320_v47, -1e+30 }
 0x338   : > { %v1470_v50 = vsel %vm1304_vm9, %v1462_v48, -inf }
 0x339   : > { %1471 = vmax.xlane.f32.xlu1 %v1470_v50  ;;  %v1358_v51 = vpop.f32.mrf.mxu3 }
 0x33a   : > { %v1464_v49 = vsel %vm1459_vm10, %v1358_v51, -1e+30  ;;  %v1379_v52 = vpop.f32.mrf.mxu0 }
 0x33b   : > { %v1476_v54 = vsel %vm1304_vm9, %v1464_v49, -inf }
 0x33d   : > { %v1339_v55 = vpop.f32.mrf.mxu2  ;;  %1477 = vmax.xlane.f32.xlu0 %v1476_v54 }
 0x33e   : > { %v1322_v56 = vpop.f32.mrf.mxu1  ;;  %v1463_v58 = vsel %vm1459_vm10, %v1339_v55, -1e+30 }
 0x33f   : > { %v1473_v60 = vsel %vm1304_vm9, %v1463_v58, -inf }
 0x340   : > { %1474 = vmax.xlane.f32.xlu2 %v1473_v60 }
 0x341   : > { %v1360_v61 = vpop.f32.mrf.mxu3 }
 0x342   : > { %v1453_v62 = vpop.f32.mrf.mxu0 }
 0x343   : > { %v2925_v53 = vsel %vm1459_vm10, %v1453_v62, -1e+30 }
 0x344   : > { %v1491_v5 = vsel %vm1304_vm9, %v2925_v53, -inf }
 0x345   : > { %v1341_v0 = vpop.f32.mrf.mxu2 }
 0x346   : > { %v1396_v10 = vpop.f32.mrf.mxu1 }
 0x347   : > { %v1466_v12 = vsel %vm1459_vm10, %v1396_v10, -1e+30 }
 0x348   : > { %1492 = vmax.xlane.f32.xlu2 %v1491_v5  ;;  %v1482_v16 = vsel %vm1304_vm9, %v1466_v12, -inf }
 0x349   : > { %1483 = vmax.xlane.f32.xlu0 %v1482_v16  ;;  %v1434_v17 = vpop.f32.mrf.mxu3 }
 0x34a   : > { %v1455_v6 = vpop.f32.mrf.mxu0  ;;  %v1468_v22 = vsel %vm1459_vm10, %v1434_v17, -1e+30 }
 0x34b   : > { %v1488_v25 = vsel %vm1304_vm9, %v1468_v22, -inf }
 0x34d   : > { %v1415_v23 = vpop.f32.mrf.mxu2 }
 0x34e   : > { %v1398_v8 = vpop.f32.mrf.mxu1  ;;  %v1467_v24 = vsel %vm1459_vm10, %v1415_v23, -1e+30 }
 0x34f   : > { %v1485_v26 = vsel %vm1304_vm9, %v1467_v24, -inf }
 0x350   : > { %1489 = vmax.xlane.f32.xlu2 %v1488_v25  ;;  %1486 = vmax.xlane.f32.xlu1 %v1485_v26 }
 0x351   : > { %v1436_v27 = vpop.f32.mrf.mxu3 }
 0x355   : > { %v1417_v28 = vpop.f32.mrf.mxu2 }
 0x35d   : > { %2446 = vrot.lane.b32.xlu0 %v2694_v18, %s2548_s15 }
 0x365   : > { %2456 = vrot.lane.b32.xlu0 %v2699_v21, %s2548_s15 }
 0x368   : > { %2451 = vrot.lane.b32.xlu2 %v2720_v44, %s2548_s15 }
 0x369   : > { %2441 = vrot.lane.b32.xlu1 %v2677_v59, %s2548_s15 }
 0x3a8   : > { %v1481_v29 = vpop.xlane.xlu0 %1480 }
 0x3a9   : > { %v1497_v33 = vsub.f32 %v1465_v45, %v1481_v29 }
 0x3ab   : > { %v1508_v21 = vmul.f32 1.442695, %v1497_v33 }
 0x3ac   : > { %v1472_v13 = vpop.xlane.xlu1 %1471 }
 0x3ad   : > { %v1494_v9 = vsub.f32 %v1462_v48, %v1472_v13 }
 0x3af   : > { %v1502_v30 = vmul.f32 1.442695, %v1494_v9 }
 0x3b0   : > { %v1478_v31 = vpop.xlane.xlu0 %1477 }
 0x3b1   : > { %2489 = vpow2.f32 %v1502_v30  ;;  %v1496_v32 = vsub.f32 %v1464_v49, %v1478_v31 }
 0x3b3   : > { %v1506_v34 = vmul.f32 1.442695, %v1496_v32  ;;  %v1475_v19 = vpop.xlane.xlu2 %1474 }
 0x3b4   : > { %v1495_v36 = vsub.f32 %v1463_v58, %v1475_v19 }
 0x3b5   : > { %2491 = vpow2.f32 %v1506_v34 }
 0x3b6   : > { %v1504_v20 = vmul.f32 1.442695, %v1495_v36 }
 0x3b7   : > { %v2939_v18 = vpop.eup %2489 }
 0x3b8   : > { %2493 = vpow2.f32 %v1504_v20  ;;  %v1518_v59 = vsel %vm1304_vm9, %v2939_v18, 0.0 }
 0x3b9   : > { %1519 = vadd.xlane.f32.xlu0 %v1518_v59  ;;  %2495 = vpow2.f32 %v1508_v21 }
 0x3bb   : > { %v2943_v44 = vpop.eup %2491  ;;  %v1493_v37 = vpop.xlane.xlu2 %1492 }
 0x3bc   : > { %v1484_v57 = vpop.xlane.xlu0 %1483  ;;  %v1524_v38 = vsel %vm1304_vm9, %v2943_v44, 0.0  ;;  %v1501_v45 = vsub.f32 %v2925_v53, %v1493_v37 }
 0x3bd   : > { %v1498_v35 = vsub.f32 %v1466_v12, %v1484_v57  ;;  %1525 = vadd.xlane.f32.xlu1 %v1524_v38 }
 0x3be   : > { %v2947_v63 = vpop.eup %2493  ;;  %v1516_v50 = vmul.f32 1.442695, %v1501_v45 }
 0x3bf   : > { %v1510_v14 = vmul.f32 1.442695, %v1498_v35  ;;  %v1521_v7 = vsel %vm1304_vm9, %v2947_v63, 0.0  ;;  %v2951_v2 = vpop.eup %2495 }
 0x3c0   : > { %1522 = vadd.xlane.f32.xlu2 %v1521_v7  ;;  %v1527_v43 = vsel %vm1304_vm9, %v2951_v2, 0.0 }
 0x3c1   : > { %2497 = vpow2.f32 %v1510_v14 }
 0x3c3   : > { %v1490_v39 = vpop.xlane.xlu2 %1489  ;;  %v1487_v40 = vpop.xlane.xlu1 %1486 }
 0x3c4   : > { %v1500_v41 = vsub.f32 %v1468_v22, %v1490_v39  ;;  %v1499_v42 = vsub.f32 %v1467_v24, %v1487_v40 }
 0x3c5   : > { %1528 = vadd.xlane.f32.xlu1 %v1527_v43 }
 0x3c6   : > { %v1514_v46 = vmul.f32 1.442695, %v1500_v41  ;;  %v1512_v47 = vmul.f32 1.442695, %v1499_v42 }
 0x3c7   : > { %v2956_v48 = vpop.eup %2497 }
 0x3c8   : > { %2499 = vpow2.f32 %v1514_v46  ;;  %v1530_v51 = vsel %vm1304_vm9, %v2956_v48, 0.0 }
 0x3c9   : > { %2501 = vpow2.f32 %v1512_v47 }
 0x3ca   : > { %2503 = vpow2.f32 %v1516_v50 }
 0x3cb   : > { %v2452_v58 = vpop.permute.xlu2 %2451 }
 0x3cc   : > { %v2454_v61 = vunpack.i.h.bf16 %v2452_v58  ;;  %v2453_v62 = vunpack.i.l.bf16 %v2452_v58 }
 0x3cd   : > { %1531 = vadd.xlane.f32.xlu1 %v1530_v51 }
 0x3ce   : > { %v2960_v49 = vpop.eup %2499  ;;  %v1146_v12 = vrot.slane %v2454_v61, 4  ;;  %v1134_v16 = vrot.slane %v2453_v62, 4 }
 0x3cf   : > { %v2962_v52 = vpop.eup %2501  ;;  %v2447_v54 = vpop.permute.xlu0 %2446  ;;  %v1536_v55 = vsel %vm1304_vm9, %v2960_v49, 0.0 }
 0x3d0   : > { %1537 = vadd.xlane.f32.xlu2 %v1536_v55  ;;  %v1533_v56 = vsel %vm1304_vm9, %v2962_v52, 0.0  ;;  %v2968_v60 = vpop.eup %2503  ;;  %v2449_v53 = vunpack.i.h.bf16 %v2447_v54  ;;  %v2448_v0 = vunpack.i.l.bf16 %v2447_v54 }
 0x3d1   : > { %1534 = vadd.xlane.f32.xlu0 %v1533_v56  ;;  %v1539_v10 = vsel %vm1304_vm9, %v2968_v60, 0.0 }
 0x3d2   : > { %v1088_v25 = vrot.slane %v2449_v53, 4  ;;  %v1076_v26 = vrot.slane %v2448_v0, 4 }
 0x3d7   : > { %v2457_v5 = vpop.permute.xlu0 %2456 }
 0x3d8   : > { %v2459_v17 = vunpack.i.h.bf16 %v2457_v5  ;;  %v2458_v6 = vunpack.i.l.bf16 %v2457_v5  ;;  %1540 = vadd.xlane.f32.xlu2 %v1539_v10 }
 0x3da   : > { %v1144_v22 = vrot.slane %v2459_v17, 4  ;;  %v1147_v23 = vsel %vm572_vm8, %v2459_v17, %v1146_v12  ;;  %v1132_v8 = vrot.slane %v2458_v6, 4  ;;  %v1135_v24 = vsel %vm572_vm8, %v2458_v6, %v1134_v16 }
 0x3db   : > { %v1155_v27 = vperm.slane %v1147_v23, %v2683_v4  ;;  %v1143_v28 = vperm.slane %v1135_v24, %v2683_v4  ;;  %v2442_v29 = vpop.permute.xlu1 %2441 }
 0x3dc   : > { %v1145_v13 = vsel %vm572_vm8, %v1144_v22, %v2454_v61  ;;  %v1133_v9 = vsel %vm572_vm8, %v1132_v8, %v2453_v62  ;;  %v2444_v30 = vunpack.i.h.bf16 %v2442_v29  ;;  %v2443_v31 = vunpack.i.l.bf16 %v2442_v29 }
 0x3dd   : > { %v1151_v32 = vperm.slane %v1145_v13, %v2683_v4  ;;  %v1168_v33 = vrot.slane %v1155_v27, 4  ;;  %v1139_v34 = vperm.slane %v1133_v9, %v2683_v4  ;;  %v1170_v19 = vrot.slane %v1143_v28, 4 }
 0x3de   : > { %v1090_v36 = vrot.slane %v2444_v30, 4  ;;  %v1077_v20 = vsel %vm572_vm8, %v1076_v26, %v2443_v31  ;;  %v1078_v21 = vrot.slane %v2443_v31, 4  ;;  %v1089_v59 = vsel %vm572_vm8, %v1088_v25, %v2444_v30 }
 0x3df   : > { %v1156_v37 = vrot.slane %v1151_v32, 4  ;;  %v1158_v57 = vrot.slane %v1139_v34, 4  ;;  %v1169_v38 = vsel %vm572_vm8, %v1168_v33, %v1143_v28  ;;  %v1171_v35 = vsel %vm572_vm8, %v1155_v27, %v1170_v19 }
 0x3e0   : > { %v1175_v14 = vperm.slane %v1169_v38, %v2691_v15  ;;  %v1179_v7 = vperm.slane %v1171_v35, %v2691_v15  ;;  %v1079_v39 = vsel %vm572_vm8, %v2448_v0, %v1078_v21  ;;  %v1083_v40 = vperm.slane %v1077_v20, %v2683_v4 }
 0x3e1   : > { %v1157_v41 = vsel %vm572_vm8, %v1156_v37, %v1139_v34  ;;  %v1159_v42 = vsel %vm572_vm8, %v1151_v32, %v1158_v57  ;;  %v1087_v43 = vperm.slane %v1079_v39, %v2683_v4  ;;  %v1091_v45 = vsel %vm572_vm8, %v2449_v53, %v1090_v36 }
 0x3e2   : > { %v1163_v46 = vperm.slane %v1157_v41, %v2691_v15  ;;  %v1167_v47 = vperm.slane %v1159_v42, %v2691_v15  ;;  %v1184_v50 = vrot.slane %v1175_v14, 4  ;;  %v1186_v51 = vrot.slane %v1179_v7, 4 }
 0x3e3   : > { %v1095_v54 = vperm.slane %v1089_v59, %v2683_v4  ;;  %v1099_v55 = vperm.slane %v1091_v45, %v2683_v4  ;;  %v1102_v56 = vrot.slane %v1083_v40, 4  ;;  %v1114_v58 = vrot.slane %v1087_v43, 4 }
 0x3e4   : > { %v1180_v61 = vrot.slane %v1163_v46, 4  ;;  %v1182_v62 = vrot.slane %v1167_v47, 4  ;;  %v1185_v0 = vsel %vm572_vm8, 0.0, %v1184_v50  ;;  %v1187_v5 = vsel %vm572_vm8, 0.0, %v1186_v51 }
 0x3e5   : > { %v1253_v53 = vsel %vm572_vm8, %v1186_v51, %v1175_v14  ;;  %v1258_v10 = vrot.slane %v1187_v5, 4  ;;  %v1100_v12 = vrot.slane %v1095_v54, 4  ;;  %v1103_v16 = vsel %vm572_vm8, %v1095_v54, %v1102_v56 }
 0x3e6   : > { %v1181_v17 = vsel %vm572_vm8, 0.0, %v1180_v61  ;;  %v1183_v6 = vsel %vm572_vm8, 0.0, %v1182_v62  ;;  %v1242_v22 = vsel %vm572_vm8, %v1182_v62, %v1163_v46  ;;  %v1111_v23 = vperm.slane %v1103_v16, %v2691_v15 }
 0x3e7   : > { %v1247_v8 = vrot.slane %v1183_v6, 4  ;;  %v1101_v24 = vsel %vm572_vm8, %v1100_v12, %v1083_v40  ;;  %v1112_v25 = vrot.slane %v1099_v55, 4  ;;  %v1115_v26 = vsel %vm572_vm8, %v1099_v55, %v1114_v58 }
 0x3e8   : > { %v1107_v27 = vperm.slane %v1101_v24, %v2691_v15  ;;  %v1123_v28 = vperm.slane %v1115_v26, %v2691_v15  ;;  %v1126_v29 = vrot.slane %v1111_v23, 4  ;;  %v1246_v13 = vperm.slane %v1242_v22, %v2683_v4 }
 0x3e9   : > { %v1113_v9 = vsel %vm572_vm8, %v1112_v25, %v1087_v43  ;;  %v1248_v30 = vsel %vm572_vm8, %v1247_v8, %v1181_v17  ;;  %v1257_v31 = vperm.slane %v1253_v53, %v2683_v4  ;;  %v1259_v32 = vsel %vm572_vm8, %v1258_v10, %v1185_v0 }
 0x3ea   : > { %v1119_v33 = vperm.slane %v1113_v9, %v2691_v15  ;;  %v1124_v34 = vrot.slane %v1107_v27, 4  ;;  %v1127_v19 = vsel %vm572_vm8, 0.0, %v1126_v29  ;;  %v1130_v36 = vrot.slane %v1123_v28, 4 }
 0x3eb   : > { %v1188_v20 = vsel %vm572_vm8, %v1126_v29, %v1107_v27  ;;  %v1193_v21 = vrot.slane %v1127_v19, 4  ;;  %v1252_v59 = vperm.slane %v1248_v30, %v2683_v4  ;;  %v1263_v37 = vperm.slane %v1259_v32, %v2683_v4 }
 0x3ec   : > { %v1125_v57 = vsel %vm572_vm8, 0.0, %v1124_v34  ;;  %v1128_v38 = vrot.slane %v1119_v33, 4  ;;  %v1131_v35 = vsel %vm572_vm8, 0.0, %v1130_v36  ;;  %v1192_v14 = vperm.slane %v1188_v20, %v2683_v4 }
 0x3ed   : > { %v1204_v7 = vrot.slane %v1131_v35, 4  ;;  %v1194_v39 = vsel %vm572_vm8, %v1193_v21, %v1125_v57  ;;  %v1199_v40 = vsel %vm572_vm8, %v1130_v36, %v1119_v33  ;;  %v1266_v41 = vrot.slane %v1246_v13, 4 }
 0x3ee   : > { %v1129_v42 = vsel %vm572_vm8, 0.0, %v1128_v38  ;;  %v1198_v43 = vperm.slane %v1194_v39, %v2683_v4  ;;  %v1203_v45 = vperm.slane %v1199_v40, %v2683_v4  ;;  %v1212_v46 = vrot.slane %v1192_v14, 4 }
 0x3ef   : > { %v1205_v47 = vsel %vm572_vm8, %v1204_v7, %v1129_v42  ;;  %v1267_v50 = vsel %vm572_vm8, %v1252_v59, %v1266_v41  ;;  %v1278_v51 = vrot.slane %v1257_v31, 4  ;;  %v1264_v54 = vrot.slane %v1252_v59, 4 }
 0x3f0   : > { %v1209_v55 = vperm.slane %v1205_v47, %v2683_v4  ;;  %v1213_v56 = vsel %vm572_vm8, %v1198_v43, %v1212_v46  ;;  %v1224_v58 = vrot.slane %v1203_v45, 4  ;;  %v1275_v61 = vperm.slane %v1267_v50, %v2691_v15 }
 0x3f1   : > { %v1221_v62 = vperm.slane %v1213_v56, %v2691_v15  ;;  %v1279_v0 = vsel %vm572_vm8, %v1263_v37, %v1278_v51  ;;  %v1210_v5 = vrot.slane %v1198_v43, 4  ;;  %v1265_v53 = vsel %vm572_vm8, %v1264_v54, %v1246_v13 }
 0x3f2   : > { %v1225_v10 = vsel %vm572_vm8, %v1209_v55, %v1224_v58  ;;  %v1287_v12 = vperm.slane %v1279_v0, %v2691_v15  ;;  %v1294_v16 = vrot.slane %v1275_v61, 4  ;;  %v1222_v17 = vrot.slane %v1209_v55, 4 }
 0x3f3   : > { %v1233_v6 = vperm.slane %v1225_v10, %v2691_v15  ;;  %v1240_v22 = vrot.slane %v1221_v62, 4  ;;  %v1211_v23 = vsel %vm572_vm8, %v1210_v5, %v1192_v14  ;;  %v1271_v8 = vperm.slane %v1265_v53, %v2691_v15 }
 0x3f4   : > { %v1295_v24 = vsel %vm572_vm8, %v1287_v12, %v1294_v16  ;;  %v1217_v25 = vperm.slane %v1211_v23, %v2691_v15  ;;  %v1223_v26 = vsel %vm572_vm8, %v1222_v17, %v1203_v45  ;;  %v1276_v27 = vrot.slane %v1263_v37, 4 }
 0x3f5   : > { %v1241_v28 = vsel %vm572_vm8, %v1233_v6, %v1240_v22  ;;  %v1303_v29 = vpack.c.bf16 %v1295_v24, %v1295_v24  ;;  %v1229_v13 = vperm.slane %v1223_v26, %v2691_v15  ;;  %v1238_v9 = vrot.slane %v1233_v6, 4 }
 0x3f6   : > { %v1299_v30 = vpack.c.bf16 %v1241_v28, %v1241_v28  ;;  %v1236_v32 = vrot.slane %v1217_v25, 4  ;;  %v1277_v33 = vsel %vm572_vm8, %v1276_v27, %v1257_v31  ;;  %v1290_v34 = vrot.slane %v1271_v8, 4 }
 0x3f7   : > { %v1704_v19 = vsel %vm1569_vm11, %v1303_v29, 0  ;;  %v1239_v36 = vsel %vm572_vm8, %v1238_v9, %v1221_v62  ;;  %v1283_v20 = vperm.slane %v1277_v33, %v2691_v15  ;;  %v1292_v21 = vrot.slane %v1287_v12, 4 }
 0x3f8   : > { %v1628_v59 = vsel %vm1569_vm11, %v1299_v30, 0  ;;  %v1237_v37 = vsel %vm572_vm8, %v1229_v13, %v1236_v32  ;;  %v1298_v57 = vpack.c.bf16 %v1239_v36, %v1239_v36  ;;  %v1234_v38 = vrot.slane %v1229_v13, 4 }
 0x3f9   : > { %1637 = vmatpush.bf16.msrb.mxu0 %v1628_v59  ;;  %v1297_v35 = vpack.c.bf16 %v1237_v37, %v1237_v37  ;;  %v1291_v14 = vsel %vm572_vm8, %v1283_v20, %v1290_v34  ;;  %v1293_v31 = vsel %vm572_vm8, %v1292_v21, %v1275_v61  ;;  %v1288_v7 = vrot.slane %v1283_v20, 4 }
 0x3fa   : > { %v1609_v39 = vsel %vm1569_vm11, %v1298_v57, 0  ;;  %v1301_v40 = vpack.c.bf16 %v1291_v14, %v1291_v14  ;;  %v1302_v41 = vpack.c.bf16 %v1293_v31, %v1293_v31  ;;  %v1235_v42 = vsel %vm572_vm8, %v1234_v38, %v1217_v25 }
 0x3fb   : > { %v1590_v43 = vsel %vm1569_vm11, %v1297_v35, 0  ;;  %1618 = vmatpush.bf16.msra.mxu3 %v1609_v39  ;;  %v1296_v45 = vpack.c.bf16 %v1235_v42, %v1235_v42  ;;  %v1289_v46 = vsel %vm572_vm8, %v1288_v7, %v1271_v8 }
 0x3fc   : > { %1599 = vmatpush.bf16.msra.mxu2 %v1590_v43  ;;  %v1666_v47 = vsel %vm1569_vm11, %v1301_v40, 0  ;;  %v1685_v50 = vsel %vm1569_vm11, %v1302_v41, 0  ;;  %v1300_v51 = vpack.c.bf16 %v1289_v46, %v1289_v46 }
 0x3fd   : > { %1713 = vmatpush.bf16.msra.mxu0 %v1704_v19  ;;  %v1571_v54 = vsel %vm1569_vm11, %v1296_v45, 0 }
 0x3fe   : > { %1580 = vmatpush.bf16.msra.mxu1 %v1571_v54  ;;  %v1647_v55 = vsel %vm1569_vm11, %v1300_v51, 0 }
 0x3ff   : > { %1694 = vmatpush.bf16.msrb.mxu3 %v1685_v50 }
 0x400   : > { %1675 = vmatpush.bf16.msrb.mxu2 %v1666_v47 }
 0x402   : > { %1656 = vmatpush.bf16.msrb.mxu1 %v1647_v55 }
 0x42c   : > { %v1520_v56 = vpop.xlane.xlu0 %1519 }
 0x42d   : > { %2505 = vrcp.f32 %v1520_v56 }
 0x430   : > { %v1526_v58 = vpop.xlane.xlu1 %1525 }
 0x431   : > { %2507 = vrcp.f32 %v1526_v58 }
 0x433   : > { %v2506_v61 = vpop.eup %2505  ;;  %v1523_v62 = vpop.xlane.xlu2 %1522 }
 0x434   : > { %v1550_v0 = vmul.f32 %v2506_v61, %v2939_v18  ;;  %2509 = vrcp.f32 %v1523_v62 }
 0x436   : > { %v1558_v5 = vpack.c.bf16 %v1550_v0, %v1550_v0 }
 0x437   : > { %v2508_v53 = vpop.eup %2507 }
 0x438   : > { %v1552_v10 = vmul.f32 %v2508_v53, %v2943_v44  ;;  %2321 = vmatmul.msk.bf16.vlgmr.msra.gmra.mxu1 %vm1304_vm9, %v1558_v5  ;;  %v1529_v12 = vpop.xlane.xlu1 %1528 }
 0x439   : > { %2511 = vrcp.f32 %v1529_v12 }
 0x43a   : > { %v2510_v16 = vpop.eup %2509  ;;  %v1560_v17 = vpack.c.bf16 %v1552_v10, %v1552_v10 }
 0x43b   : > { %v1551_v6 = vmul.f32 %v2510_v16, %v2947_v63 }
 0x43c   : > { %2323 = vmatmul.msk.bf16.vlgmr.msra.gmra.mxu3 %vm1304_vm9, %v1560_v17 }
 0x43d   : > { %v1559_v22 = vpack.c.bf16 %v1551_v6, %v1551_v6 }
 0x43f   : > { %v2512_v23 = vpop.eup %2511  ;;  %2322 = vmatmul.msk.bf16.vlgmr.msra.gmra.mxu2 %vm1304_vm9, %v1559_v22 }
 0x440   : > { %v1553_v18 = vmul.f32 %v2512_v23, %v2951_v2  ;;  %v1532_v8 = vpop.xlane.xlu1 %1531 }
 0x441   : > { %2513 = vrcp.f32 %v1532_v8 }
 0x442   : > { %v1561_v24 = vpack.c.bf16 %v1553_v18, %v1553_v18 }
 0x443   : > { %v1538_v44 = vpop.xlane.xlu2 %1537 }
 0x444   : > { %2515 = vrcp.f32 %v1538_v44  ;;  %v1535_v25 = vpop.xlane.xlu0 %1534  ;;  %2324 = vmatmul.msk.bf16.vlgmr.msrb.gmra.mxu0 %vm1304_vm9, %v1561_v24 }
 0x445   : > { %2517 = vrcp.f32 %v1535_v25 }
 0x447   : > { %v2514_v26 = vpop.eup %2513 }
 0x448   : > { %v1554_v63 = vmul.f32 %v2514_v26, %v2956_v48 }
 0x44a   : > { %v2516_v27 = vpop.eup %2515  ;;  %v1562_v28 = vpack.c.bf16 %v1554_v63, %v1554_v63 }
 0x44b   : > { %v2518_v29 = vpop.eup %2517  ;;  %v1556_v13 = vmul.f32 %v2516_v27, %v2960_v49  ;;  %v1541_v9 = vpop.xlane.xlu2 %1540 }
 0x44c   : > { %v1555_v2 = vmul.f32 %v2518_v29, %v2962_v52  ;;  %2519 = vrcp.f32 %v1541_v9  ;;  %2325 = vmatmul.msk.bf16.vlgmr.msrb.gmra.mxu1 %vm1304_vm9, %v1562_v28 }
 0x44d   : > { %v1564_v30 = vpack.c.bf16 %v1556_v13, %v1556_v13 }
 0x44e   : > { %v1563_v32 = vpack.c.bf16 %v1555_v2, %v1555_v2 }
 0x44f   : > { %2327 = vmatmul.msk.bf16.vlgmr.msrb.gmra.mxu3 %vm1304_vm9, %v1564_v30 }
 0x450   : > { %2326 = vmatmul.msk.bf16.vlgmr.msrb.gmra.mxu2 %vm1304_vm9, %v1563_v32 }
 0x452   : > { %v2520_v33 = vpop.eup %2519 }
 0x453   : > { %v1557_v48 = vmul.f32 %v2520_v33, %v2968_v60 }
 0x455   : > { %v1565_v34 = vpack.c.bf16 %v1557_v48, %v1557_v48 }
 0x457   : > { %2328 = vmatmul.msk.bf16.vlgmr.msra.gmra.mxu0 %vm1304_vm9, %v1565_v34 }
 0x4b5   : > { %v1582_v19 = vpop.f32.mrf.mxu1 }
 0x4b6   : > { %v1721_v36 = vrot.slane %v1582_v19, 4 }
 0x4bd   : > { %v1584_v49 = vpop.f32.mrf.mxu1 }
 0x4bf   : > { %v1620_v20 = vpop.f32.mrf.mxu3 }
 0x4c0   : > { %v1719_v52 = vrot.slane %v1620_v20, 4  ;;  %v1722_v21 = vsel %vm572_vm8, %v1620_v20, %v1721_v36 }
 0x4c1   : > { %v1730_v59 = vperm.slane %v1722_v21, %v2683_v4  ;;  %v1639_v37 = vpop.f32.mrf.mxu0 }
 0x4c2   : > { %v1601_v57 = vpop.f32.mrf.mxu2  ;;  %v1720_v38 = vsel %vm572_vm8, %v1719_v52, %v1582_v19  ;;  %v1731_v35 = vrot.slane %v1639_v37, 4 }
 0x4c3   : > { %v1733_v14 = vrot.slane %v1601_v57, 4  ;;  %v1726_v60 = vperm.slane %v1720_v38, %v2683_v4  ;;  %v1757_v31 = vrot.slane %v1730_v59, 4 }
 0x4c4   : > { %v1732_v7 = vsel %vm572_vm8, %v1731_v35, %v1601_v57 }
 0x4c5   : > { %v1745_v39 = vrot.slane %v1726_v60, 4  ;;  %v1734_v40 = vsel %vm572_vm8, %v1639_v37, %v1733_v14  ;;  %v1738_v41 = vperm.slane %v1732_v7, %v2683_v4 }
 0x4c6   : > { %v1742_v42 = vperm.slane %v1734_v40, %v2683_v4 }
 0x4c7   : > { %v1743_v43 = vrot.slane %v1738_v41, 4  ;;  %v1746_v45 = vsel %vm572_vm8, %v1738_v41, %v1745_v39  ;;  %v1622_v46 = vpop.f32.mrf.mxu3 }
 0x4c8   : > { %v1754_v47 = vperm.slane %v1746_v45, %v2691_v15  ;;  %v1755_v50 = vrot.slane %v1742_v42, 4  ;;  %v1758_v51 = vsel %vm572_vm8, %v1742_v42, %v1757_v31 }
 0x4c9   : > { %v1744_v54 = vsel %vm572_vm8, %v1743_v43, %v1726_v60  ;;  %v1766_v55 = vperm.slane %v1758_v51, %v2691_v15  ;;  %v1641_v56 = vpop.f32.mrf.mxu0  ;;  %v1658_v58 = vpop.f32.mrf.mxu1 }
 0x4ca   : > { %v1750_v61 = vperm.slane %v1744_v54, %v2691_v15  ;;  %v1756_v62 = vsel %vm572_vm8, %v1755_v50, %v1730_v59  ;;  %v1769_v0 = vrot.slane %v1754_v47, 4  ;;  %v1603_v5 = vpop.f32.mrf.mxu2  ;;  %v1777_v29 = vrot.slane %v1658_v58, 4 }
 0x4cb   : > { %v1762_v53 = vperm.slane %v1756_v62, %v2691_v15  ;;  %v1773_v10 = vrot.slane %v1766_v55, 4 }
 0x4cc   : > { %v1767_v12 = vrot.slane %v1750_v61, 4  ;;  %v1770_v16 = vsel %vm572_vm8, 0.0, %v1769_v0  ;;  %v1831_v17 = vsel %vm572_vm8, %v1769_v0, %v1750_v61 }
 0x4cd   : > { %v1771_v6 = vrot.slane %v1762_v53, 4  ;;  %v1774_v22 = vsel %vm572_vm8, 0.0, %v1773_v10  ;;  %v1836_v23 = vrot.slane %v1770_v16, 4  ;;  %v1842_v18 = vsel %vm572_vm8, %v1773_v10, %v1762_v53 }
 0x4ce   : > { %v1847_v8 = vrot.slane %v1774_v22, 4  ;;  %v1768_v24 = vsel %vm572_vm8, 0.0, %v1767_v12  ;;  %v1846_v26 = vperm.slane %v1842_v18, %v2683_v4  ;;  %v1835_v27 = vperm.slane %v1831_v17, %v2683_v4 }
 0x4cf   : > { %v1772_v44 = vsel %vm572_vm8, 0.0, %v1771_v6  ;;  %v1837_v25 = vsel %vm572_vm8, %v1836_v23, %v1768_v24 }
 0x4d0   : > { %v1848_v63 = vsel %vm572_vm8, %v1847_v8, %v1772_v44  ;;  %v1841_v28 = vperm.slane %v1837_v25, %v2683_v4  ;;  %v1867_v34 = vrot.slane %v1846_v26, 4  ;;  %v1855_v20 = vrot.slane %v1835_v27, 4 }
 0x4d1   : > { %v1660_v13 = vpop.f32.mrf.mxu1  ;;  %v1852_v30 = vperm.slane %v1848_v63, %v2683_v4 }
 0x4d2   : > { %v1696_v9 = vpop.f32.mrf.mxu3  ;;  %v1853_v2 = vrot.slane %v1841_v28, 4  ;;  %v1856_v39 = vsel %vm572_vm8, %v1841_v28, %v1855_v20 }
 0x4d3   : > { %v1677_v32 = vpop.f32.mrf.mxu2  ;;  %v1775_v33 = vrot.slane %v1696_v9, 4  ;;  %v1778_v48 = vsel %vm572_vm8, %v1696_v9, %v1777_v29  ;;  %v1865_v60 = vrot.slane %v1852_v30, 4  ;;  %v1868_v40 = vsel %vm572_vm8, %v1852_v30, %v1867_v34 }
 0x4d4   : > { %v1789_v19 = vrot.slane %v1677_v32, 4  ;;  %v1786_v49 = vperm.slane %v1778_v48, %v2683_v4  ;;  %v1715_v36 = vpop.f32.mrf.mxu0  ;;  %v1854_v38 = vsel %vm572_vm8, %v1853_v2, %v1835_v27  ;;  %v1864_v16 = vperm.slane %v1856_v39, %v2691_v15 }
 0x4d5   : > { %v1776_v52 = vsel %vm572_vm8, %v1775_v33, %v1658_v58  ;;  %v1787_v21 = vrot.slane %v1715_v36, 4  ;;  %v3117_v43 = vperm.slane %v1854_v38, %v2691_v15  ;;  %v1866_v45 = vsel %vm572_vm8, %v1865_v60, %v1846_v26 }
 0x4d6   : > { %v1782_v59 = vperm.slane %v1776_v52, %v2683_v4  ;;  %v1813_v37 = vrot.slane %v1786_v49, 4  ;;  %v1790_v57 = vsel %vm572_vm8, %v1715_v36, %v1789_v19  ;;  %v1872_v54 = vperm.slane %v1866_v45, %v2691_v15 }
 0x4d7   : > { %v1788_v35 = vsel %vm572_vm8, %v1787_v21, %v1677_v32  ;;  %v1798_v14 = vperm.slane %v1790_v57, %v2683_v4  ;;  %v1876_v17 = vperm.slane %v1868_v40, %v2691_v15  ;;  %v1883_v34 = vrot.slane %v1864_v16, 4 }
 0x4d8   : > { %v1801_v31 = vrot.slane %v1782_v59, 4  ;;  %v1794_v7 = vperm.slane %v1788_v35, %v2683_v4  ;;  %v1877_v53 = vrot.slane %v1872_v54, 4 }
 0x4d9   : > { %v1811_v41 = vrot.slane %v1798_v14, 4  ;;  %v1814_v42 = vsel %vm572_vm8, %v1798_v14, %v1813_v37  ;;  %v1881_v48 = vrot.slane %v1876_v17, 4 }
 0x4da   : > { %v1799_v46 = vrot.slane %v1794_v7, 4  ;;  %v1802_v47 = vsel %vm572_vm8, %v1794_v7, %v1801_v31  ;;  %v1822_v50 = vperm.slane %v1814_v42, %v2691_v15  ;;  %v1698_v51 = vpop.f32.mrf.mxu3  ;;  %v3134_v18 = vsel %vm572_vm8, %v1877_v53, %v3117_v43 }
 0x4db   : > { %v1810_v55 = vperm.slane %v1802_v47, %v2691_v15  ;;  %v1812_v56 = vsel %vm572_vm8, %v1811_v41, %v1786_v49  ;;  %v1679_v58 = vpop.f32.mrf.mxu2  ;;  %v1882_v60 = vsel %vm572_vm8, %v1881_v48, %v1864_v16  ;;  %v1884_v31 = vsel %vm572_vm8, %v1876_v17, %v1883_v34  ;;  %v2385_v51 = vld [vmem:[%s3251_s5] sm:$0xff] }
 0x4dc   : > { %v1800_v61 = vsel %vm572_vm8, %v1799_v46, %v1782_v59  ;;  %v1818_v62 = vperm.slane %v1812_v56, %v2691_v15  ;;  %v1829_v0 = vrot.slane %v1822_v50, 4  ;;  %v1717_v5 = vpop.f32.mrf.mxu0  ;;  %v1879_v59 = vrot.slane %v3117_v43, 4  ;;  %v2386_v50 = vld [vmem:[%s3251_s5 + $0x8] sm:$0xff] }
 0x4dd   : > { %v1806_v10 = vperm.slane %v1800_v61, %v2691_v15  ;;  %v1825_v12 = vrot.slane %v1810_v55, 4  ;;  %2001 = vmatpush.bf16.msra.mxu1 %v2386_v50 }
 0x4de   : > { %v1827_v6 = vrot.slane %v1818_v62, 4  ;;  %v1830_v22 = vsel %vm572_vm8, 0.0, %v1829_v0  ;;  %v1896_v23 = vsel %vm572_vm8, %v1829_v0, %v1818_v62  ;;  %v1880_v45 = vsel %vm572_vm8, %v1872_v54, %v1879_v59 }
 0x4df   : > { %v1823_v8 = vrot.slane %v1806_v10, 4  ;;  %v1826_v24 = vsel %vm572_vm8, 0.0, %v1825_v12  ;;  %v1885_v44 = vsel %vm572_vm8, %v1825_v12, %v1806_v10  ;;  %v1900_v25 = vperm.slane %v1896_v23, %v2683_v4 }
 0x4e0   : > { %v1828_v26 = vsel %vm572_vm8, 0.0, %v1827_v6  ;;  %v1890_v63 = vrot.slane %v1826_v24, 4  ;;  %v1901_v27 = vrot.slane %v1830_v22, 4  ;;  %v1889_v28 = vperm.slane %v1885_v44, %v2683_v4 }
 0x4e1   : > { %v1921_v29 = vrot.slane %v1900_v25, 4  ;;  %v1824_v13 = vsel %vm572_vm8, 0.0, %v1823_v8  ;;  %2002 = vmatpush.bf16.msra.mxu1 %v2385_v51  ;;  %v2478_v8 = vld [vmem:[%s3252_s6] ss:$0 sm:$0xff] }
 0x4e2   : > { %v1902_v9 = vsel %vm572_vm8, %v1901_v27, %v1828_v26  ;;  %v1891_v2 = vsel %vm572_vm8, %v1890_v63, %v1824_v13  ;;  %v1909_v30 = vrot.slane %v1889_v28, 4 }
 0x4e3   : > { %v1906_v32 = vperm.slane %v1902_v9, %v2683_v4  ;;  %v1895_v33 = vperm.slane %v1891_v2, %v2683_v4 }
 0x4e5   : > { %v1910_v19 = vsel %vm572_vm8, %v1895_v33, %v1909_v30  ;;  %v1922_v49 = vsel %vm572_vm8, %v1906_v32, %v1921_v29  ;;  %v1907_v36 = vrot.slane %v1895_v33, 4  ;;  %v1919_v20 = vrot.slane %v1906_v32, 4 }
 0x4e6   : > { %v1918_v52 = vperm.slane %v1910_v19, %v2691_v15  ;;  %v1930_v21 = vperm.slane %v1922_v49, %v2691_v15 }
 0x4e7   : > { %v1908_v37 = vsel %vm572_vm8, %v1907_v36, %v1889_v28  ;;  %v1920_v57 = vsel %vm572_vm8, %v1919_v20, %v1900_v25  ;;  %v2388_v36 = vld [vmem:[%s3255_s9 + $0x8] sm:$0xff]  ;;  %v2387_v20 = vld [vmem:[%s3255_s9] sm:$0xff] }
 0x4e8   : > { %v1935_v38 = vrot.slane %v1930_v21, 4  ;;  %v1937_v4 = vrot.slane %v1918_v52, 4  ;;  %v1914_v35 = vperm.slane %v1908_v37, %v2691_v15  ;;  %v1926_v14 = vperm.slane %v1920_v57, %v2691_v15  ;;  %2097 = vmatpush.bf16.msra.mxu2 %v2388_v36 }
 0x4ea   : > { %v1936_v7 = vsel %vm572_vm8, %v1935_v38, %v1918_v52  ;;  %v1938_v39 = vsel %vm572_vm8, %v1930_v21, %v1937_v4  ;;  %v1931_v40 = vrot.slane %v1926_v14, 4  ;;  %v1933_v41 = vrot.slane %v1914_v35, 4 }
 0x4eb   : > { %v2465_v42 = vpack.i.bf16 %v1936_v7, %v1882_v60  ;;  %v2470_v43 = vpack.i.bf16 %v1938_v39, %v1884_v31 }
 0x4ec   : > { %v1934_v46 = vsel %vm572_vm8, %v1926_v14, %v1933_v41  ;;  %v1932_v47 = vsel %vm572_vm8, %v1931_v40, %v1914_v35  ;;  %2098 = vmatpush.bf16.msra.mxu2 %v2387_v20 }
 0x4ed   : > { %2466 = vrot.lane.b32.xlu1 %v2465_v42, %s2549_s16  ;;  %2471 = vrot.lane.b32.xlu2 %v2470_v43, %s2550_s17  ;;  %v2460_v15 = vpack.i.bf16 %v1934_v46, %v1880_v45  ;;  %v2480_v46 = vld [vmem:[%s3254_s8] ss:$0 sm:$0xff] }
 0x4ef   : > { %2461 = vrot.lane.b32.xlu0 %v2460_v15, %s2551_s18 }
 0x547   : > { %v2472_v55 = vpop.permute.xlu2 %2471 }
 0x548   : > { %v2474_v5 = vunpack.i.h.bf16 %v2472_v55  ;;  %v2473_v53 = vunpack.i.l.bf16 %v2472_v55 }
 0x55f   : > { %v2467_v54 = vpop.permute.xlu1 %2466 }
 0x560   : > { %v2469_v62 = vunpack.i.h.bf16 %v2467_v54  ;;  %v2468_v0 = vunpack.i.l.bf16 %v2467_v54 }
 0x561   : > { %v2462_v56 = vpop.permute.xlu0 %2461 }
 0x562   : > { %v2464_v58 = vunpack.i.h.bf16 %v2462_v56  ;;  %v2463_v61 = vunpack.i.l.bf16 %v2462_v56  ;;  %v2396_v56 = vld [vmem:[%s3257_s11 + $0x38] sm:$0xff] }
 0x563   : > { %2212 = vmatpush.bf16.msra.mxu3 %v2396_v56 }
 0x564   : > { %v1963_v10 = vsel %vm1304_vm9, %v3134_v18, %v2463_v61  ;;  %v1964_v12 = vsel %vm1304_vm9, %v1932_v47, %v2464_v58  ;;  %v2481_v58 = vld [vmem:[%s3256_s10] ss:$0 sm:$0xff]  ;;  %v2395_v61 = vld [vmem:[%s3257_s11 + $0x30] sm:$0xff] }
 0x565   : > { %v1966_v16 = vsel %vm1965_vm12, %v1963_v10, %v2468_v0  ;;  %v1967_v17 = vsel %vm1965_vm12, %v1964_v12, %v2469_v62  ;;  %v2393_v12 = vld [vmem:[%s3257_s11 + $0x20] sm:$0xff]  ;;  %vm2236_vm12 = vcmask 257024  }
 0x566   : > { %v1969_v6 = vsel %vm1968_vm13, %v1966_v16, %v2473_v53  ;;  %v1970_v22 = vsel %vm1968_vm13, %v1967_v17, %v2474_v5  ;;  %v2394_v5 = vld [vmem:[%s3257_s11 + $0x28] sm:$0xff] }
 0x567   : > { %v1971_v23 = vpack.c.bf16 %v1970_v22, %v1969_v6  ;;  %2213 = vmatpush.bf16.msra.mxu3 %v2395_v61  ;;  %v2392_v6 = vld [vmem:[%s3257_s11 + $0x18] sm:$0xff] }
 0x569   : > { %2337 = vmatmul.msk.bf16.vlgmr.msra.gmra.mxu1 %vm451_vm0, %v1971_v23  ;;  %v2391_v23 = vld [vmem:[%s3257_s11 + $0x10] sm:$0xff] }
 0x56b   : > { %2214 = vmatpush.bf16.msra.mxu3 %v2394_v5 }
 0x56f   : > { %2215 = vmatpush.bf16.msra.mxu3 %v2393_v12 }
 0x573   : > { %2216 = vmatpush.bf16.msra.mxu3 %v2392_v6 }
 0x577   : > { %2217 = vmatpush.bf16.msra.mxu3 %v2391_v23 }
 0x5e6   : > { %v2004_v24 = vpop.f32.mrf.mxu1 }
 0x5e7   : > { %v2005_v44 = vadd.f32 %v2478_v8, %v2004_v24 }
 0x5e9   : > { %v3176_v25 = vadd.f32 %v2638_v1, %v2005_v44 }
 0x5eb   : > { %v2013_v18 = vsel %vm451_vm0, %v3176_v25, 0.0 }
 0x5ec   : > { %2014 = vadd.xlane.f32.xlu0 %v2013_v18  ;;  %v2390_v18 = vld [vmem:[%s3257_s11 + $0x8] sm:$0xff] }
 0x5ed   : > { %2218 = vmatpush.bf16.msra.mxu3 %v2390_v18 }
 0x5ee   : > { %v2006_v26 = vpop.f32.mrf.mxu1 }
 0x5ef   : > { %v2007_v63 = vadd.f32 %v2478_v8, %v2006_v26  ;;  %v2389_v26 = vld [vmem:[%s3257_s11] sm:$0xff] }
 0x5f1   : > { %v3181_v27 = vadd.f32 %v2642_v3, %v2007_v63  ;;  %2219 = vmatpush.bf16.msra.mxu3 %v2389_v26 }
 0x5f3   : > { %v2016_v28 = vsel %vm451_vm0, %v3181_v27, 0.0 }
 0x5f4   : > { %2017 = vadd.xlane.f32.xlu1 %v2016_v28 }
 0x65f   : > { %v2015_v29 = vpop.xlane.xlu0 %2014 }
 0x660   : > { %v2019_v13 = vmul.f32 %v2015_v29, %v2646_v11 }
 0x662   : > { %v2021_v9 = vsub.f32 %v3176_v25, %v2019_v13 }
 0x664   : > { %v2023_v1 = vmul.f32 %v2021_v9, %v2021_v9 }
 0x666   : > { %v2025_v2 = vsel %vm451_vm0, %v2023_v1, 0.0 }
 0x667   : > { %v2018_v30 = vpop.xlane.xlu1 %2017  ;;  %2026 = vadd.xlane.f32.xlu2 %v2025_v2 }
 0x668   : > { %v2020_v32 = vmul.f32 %v2018_v30, %v2646_v11 }
 0x66a   : > { %v2022_v33 = vsub.f32 %v3181_v27, %v2020_v32 }
 0x66c   : > { %v2024_v3 = vmul.f32 %v2022_v33, %v2022_v33 }
 0x66e   : > { %v2028_v48 = vsel %vm451_vm0, %v2024_v3, 0.0 }
 0x66f   : > { %2029 = vadd.xlane.f32.xlu0 %v2028_v48 }
 0x6da   : > { %v2027_v34 = vpop.xlane.xlu2 %2026 }
 0x6db   : > { %v2031_v19 = vmul.f32 %v2027_v34, %v2646_v11 }
 0x6dd   : > { %v2033_v49 = vadd.f32 1e-05, %v2031_v19 }
 0x6df   : > { %2521 = vrsqrt.f32 %v2033_v49  ;;  %vm2041_vm15 = vweird.f32 %v2033_v49 }
 0x6e2   : > { %v2030_v52 = vpop.xlane.xlu0 %2029 }
 0x6e3   : > { %v2032_v21 = vmul.f32 %v2030_v52, %v2646_v11  ;;  %v2479_v11 = vld [vmem:[%s3253_s7] ss:$0 sm:$0xff] }
 0x6e5   : > { %v2522_v59 = vpop.eup %2521  ;;  %v2034_v37 = vadd.f32 1e-05, %v2032_v21 }
 0x6e6   : > { %v2036_v57 = vmul.f32 %v2522_v59, %v2033_v49  ;;  %vm2042_vm14 = vweird.f32 %v2522_v59 }
 0x6e7   : > { %2523 = vrsqrt.f32 %v2034_v37  ;;  %vm2043_vm1 = vmor %vm2041_vm15, %vm2042_vm14  ;;  %vm2051_vm3 = vweird.f32 %v2034_v37 }
 0x6e8   : > { %v2037_v38 = vmul.f32 %v2522_v59, %v2036_v57 }
 0x6ea   : > { %v2038_v4 = vmul.f32 0.5, %v2037_v38 }
 0x6ec   : > { %v2039_v35 = vsub.f32 1.5, %v2038_v4 }
 0x6ed   : > { %v2524_v14 = vpop.eup %2523 }
 0x6ee   : > { %v2040_v60 = vmul.f32 %v2522_v59, %v2039_v35  ;;  %v2046_v31 = vmul.f32 %v2524_v14, %v2034_v37  ;;  %vm2052_vm2 = vweird.f32 %v2524_v14 }
 0x6ef   : > { %vm2053_vm4 = vmor %vm2051_vm3, %vm2052_vm2 }
 0x6f0   : > { %v2047_v7 = vmul.f32 %v2524_v14, %v2046_v31  ;;  %v2044_v39 = vsel %vm2043_vm1, %v2522_v59, %v2040_v60 }
 0x6f1   : > { %v2055_v42 = vmul.f32 %v2044_v39, %v2021_v9 }
 0x6f2   : > { %v2048_v40 = vmul.f32 0.5, %v2047_v7 }
 0x6f3   : > { %v2060_v47 = vmul.f32 %v2479_v11, %v2055_v42 }
 0x6f4   : > { %v2049_v41 = vsub.f32 1.5, %v2048_v40 }
 0x6f5   : > { %v2065_v51 = vadd.f32 %v2480_v46, %v2060_v47 }
 0x6f6   : > { %v2050_v43 = vmul.f32 %v2524_v14, %v2049_v41 }
 0x6f8   : > { %v2054_v45 = vsel %vm2053_vm4, %v2524_v14, %v2050_v43  ;;  %v2482_v14 = vld [vmem:[%s3258_s12] ss:$0 sm:$0xff] }
 0x6f9   : > { %v2056_v15 = vmul.f32 %v2054_v45, %v2022_v33 }
 0x6fb   : > { %v2061_v50 = vmul.f32 %v2479_v11, %v2056_v15 }
 0x6fd   : > { %v2066_v54 = vadd.f32 %v2480_v46, %v2061_v50 }
 0x6ff   : > { %v2067_v55 = vpack.c.bf16 %v2066_v54, %v2065_v51 }
 0x701   : > { %2346 = vmatmul.msk.bf16.vlgmr.msra.gmra.mxu2 %vm451_vm0, %v2067_v55 }
 0x784   : > { %v2100_v62 = vpop.f32.mrf.mxu2 }
 0x785   : > { %v2101_v0 = vadd.f32 %v2481_v58, %v2100_v62 }
 0x787   : > { %v2347_v53 = vmul.f32 -1.702, %v2101_v0 }
 0x789   : > { %v2109_v10 = vmul.f32 1.442695, %v2347_v53 }
 0x78b   : > { %2525 = vpow2.f32 %v2109_v10 }
 0x78c   : > { %v2102_v16 = vpop.f32.mrf.mxu2 }
 0x78d   : > { %v2103_v17 = vadd.f32 %v2481_v58, %v2102_v16 }
 0x78f   : > { %v2348_v22 = vmul.f32 -1.702, %v2103_v17 }
 0x791   : > { %v2526_v8 = vpop.eup %2525  ;;  %v2111_v24 = vmul.f32 1.442695, %v2348_v22 }
 0x792   : > { %v2113_v44 = vadd.f32 1.0, %v2526_v8 }
 0x793   : > { %2527 = vpow2.f32 %v2111_v24 }
 0x794   : > { %2529 = vrcp.f32 %v2113_v44  ;;  %v2126_v33 = vand.u32 2147483648, %v2113_v44  ;;  %vm2120_vm5 = vweird.f32 %v2113_v44  ;;  %v2124_v3 = vand.u32 2147483647, %v2113_v44 }
 0x796   : > { %v2127_v20 = vor.u32 1.1754944e-38, %v2126_v33  ;;  %vm2125_vm8 = vcmp.eq.f32.partialorder %v2124_v3, 8.507059e+37 }
 0x799   : > { %v2528_v63 = vpop.eup %2527 }
 0x79a   : > { %v2530_v28 = vpop.eup %2529  ;;  %v2114_v29 = vadd.f32 1.0, %v2528_v63 }
 0x79b   : > { %v2116_v13 = vmul.f32 %v2530_v28, %v2113_v44  ;;  %vm2121_vm0 = vweird.f32 %v2530_v28 }
 0x79c   : > { %2531 = vrcp.f32 %v2114_v29  ;;  %vm2122_vm6 = vmor %vm2120_vm5, %vm2121_vm0  ;;  %v2141_v34 = vand.u32 2147483648, %v2114_v29  ;;  %v2139_v36 = vand.u32 2147483647, %v2114_v29  ;;  %vm2135_vm9 = vweird.f32 %v2114_v29 }
 0x79d   : > { %v2117_v9 = vsub.f32 1.0, %v2116_v13 }
 0x79e   : > { %v2142_v59 = vor.u32 1.1754944e-38, %v2141_v34  ;;  %vm2140_vm11 = vcmp.eq.f32.partialorder %v2139_v36, 8.507059e+37 }
 0x79f   : > { %v2118_v1 = vmul.f32 %v2530_v28, %v2117_v9 }
 0x7a1   : > { %v2119_v30 = vadd.f32 %v2530_v28, %v2118_v1 }
 0x7a2   : > { %v2532_v2 = vpop.eup %2531 }
 0x7a3   : > { %v2131_v32 = vmul.f32 %v2532_v2, %v2114_v29  ;;  %v2123_v19 = vsel %vm2122_vm6, %v2530_v28, %v2119_v30  ;;  %vm2136_vm7 = vweird.f32 %v2532_v2 }
 0x7a4   : > { %v2128_v21 = vsel %vm2125_vm8, %v2127_v20, %v2123_v19  ;;  %vm2137_vm10 = vmor %vm2135_vm9, %vm2136_vm7 }
 0x7a5   : > { %v2132_v48 = vsub.f32 1.0, %v2131_v32  ;;  %v2145_v38 = vmul.f32 %v2128_v21, %v2101_v0 }
 0x7a7   : > { %v2133_v49 = vmul.f32 %v2532_v2, %v2132_v48 }
 0x7a9   : > { %v2134_v52 = vadd.f32 %v2532_v2, %v2133_v49 }
 0x7ab   : > { %v2138_v37 = vsel %vm2137_vm10, %v2532_v2, %v2134_v52 }
 0x7ac   : > { %v2143_v57 = vsel %vm2140_vm11, %v2142_v59, %v2138_v37 }
 0x7ad   : > { %v2146_v4 = vmul.f32 %v2143_v57, %v2103_v17 }
 0x7af   : > { %v2147_v35 = vpack.c.bf16 %v2146_v4, %v2145_v38 }
 0x7b1   : > { %2220 = vmatmul.bf16.vlgmr.msra.gmra.mxu3 %v2147_v35 }
 0x834   : > { %v2221_v60 = vpop.f32.mrf.mxu3 }
 0x835   : > { %v2226_v31 = vadd.f32 %v2221_v60, %v3176_v25 }
 0x837   : > { %v2232_v7 = vadd.f32 %v2482_v14, %v2226_v31 }
 0x839   : > { %v2234_v39 = vpack.c.bf16 %v2232_v7, %v2232_v7 }
 0x83b   : > { %2237 = vst.msk [vmem:[%s442_s30] sm:$0xf] %vm2236_vm12, %v2234_v39 }
 0x83c   : > { %v2223_v40 = vpop.f32.mrf.mxu3 }
 0x83d   : > { %v2227_v41 = vadd.f32 %v2223_v40, %v3181_v27 }
 0x83f   : > { %v2233_v11 = vadd.f32 %v2482_v14, %v2227_v41 }
 0x841   : > { %v2235_v42 = vpack.c.bf16 %v2233_v11, %v2233_v11 }
 0x843   : > { %2238 = vst.msk [vmem:[%s442_s30 + $0x4] sm:$0xf] %vm2236_vm12, %v2235_v42 }
 0x844 PF: > { %s23_s25 = sadd.s32 1, %s2539_s25  }
 0x845   : > { %p20_p4 = scmp.ge.s32.totalorder %s23_s25, 4  }
 0x847   :  { %22 = sbr.rel (!%p20_p4) target bundleno = 1 (0x1), region = 102 }

</bundles_post_ra>
